<compile_context>
chip_gen: v7x
topology: tpu7x:2x2x1
jax: 0.10.0
libtpu: 0.0.40
codegen_flags: <defaults>
</compile_context>

<pallas_src>
import functools
import math

import jax
import jax.numpy as jnp
from jax.experimental import pallas as pl
from jax.experimental.pallas import tpu as pltpu


def log2_diff(a, b):
    return abs(int(round(math.log2(a))) - int(round(math.log2(b))))


def _round_up(n, m):
    return ((n + m - 1) // m) * m


# ----------------------------- Pallas kernel ------------------------------- #

def _mish(z):
    """mish(z) = z * tanh(softplus(z)) = z * e(e+2) / (e(e+2) + 2),  e = exp(z).

    One exp (EUP) + one exact divide; guarded for large z where the factor -> 1.
    """
    e = jnp.exp(jnp.minimum(z, 20.0))
    num = e * (e + 2.0)
    t = num / (num + 2.0)
    return jnp.where(z > 20.0, z, z * t)


def _fused_encoder_kernel(*refs, layer_dims, bb):
    """Whole FeatMapToLatent for one batch block, activations resident in VMEM.

    refs layout:
      [x] + [w_i, scale_i, shift_i]*n_layers + [whead, bhead]   (inputs)
      [o]                                                       (output)
      [act_i]*n_layers                                          (scratch, f32 padded planes)
    """
    n_layers = len(layer_dims)
    x_ref = refs[0]
    pos = 1
    wrefs = []
    for _ in range(n_layers):
        wrefs.append((refs[pos], refs[pos + 1], refs[pos + 2]))
        pos += 3
    wh_ref, bh_ref = refs[pos], refs[pos + 1]
    o_ref = refs[pos + 2]
    act_refs = refs[pos + 3:pos + 3 + n_layers]

    # Stage the input block into the zero-bordered layer-0 plane (pad=1 in VMEM,
    # no XLA pad / no HBM blow-up).
    h0, w0 = layer_dims[0][0], layer_dims[0][1]
    a0 = act_refs[0]
    a0[...] = jnp.zeros_like(a0)
    a0[:, 1:h0 + 1, 1:w0 + 1, :] = x_ref[...].astype(a0.dtype)

    y = None
    for i, (h, w, cin, cout) in enumerate(layer_dims):
        ho, wo = h // 2, w // 2
        w_ref, scale_ref, shift_ref = wrefs[i]
        a_ref = act_refs[i]

        # Implicit-GEMM 3x3 / stride-2 / pad-1 conv: gather the 9 taps with
        # stride-2 reads from the padded plane and contract them in ONE dot.
        # Tap order (dy major, dx minor, channel fastest) matches the
        # (3, 3, Cin, Cout) -> (9*Cin, Cout) reshape of the weight.
        taps = []
        for dy in range(3):
            for dx in range(3):
                t = a_ref[:, pl.ds(dy, ho, stride=2), pl.ds(dx, wo, stride=2), :]
                taps.append(t.astype(jnp.bfloat16))
        patches = jnp.concatenate(taps, axis=-1)             # (bb, ho, wo, 9*cin)
        patches = patches.reshape(bb * ho * wo, 9 * cin)     # lane dim = K, M rows

        z = jnp.dot(patches, w_ref[...], preferred_element_type=jnp.float32)
        z = z * scale_ref[...] + shift_ref[...]              # folded conv bias + BN affine
        y = _mish(z)                                         # (M, cout) f32

        if i + 1 < n_layers:
            nxt = act_refs[i + 1]
            nxt[...] = jnp.zeros_like(nxt)                   # keep the 1-px zero border
            nxt[:, 1:ho + 1, 1:wo + 1, :] = y.reshape(bb, ho, wo, cout).astype(nxt.dtype)

    # Head: torch.mean(x, (2,3)) + FullyConnectedLayer, fused.  1/(ho*wo) is
    # folded into whead at init, so this is a spatial SUM + one small f32 dot.
    # (When needs_avg_pool is False the final plane is 1x1 and sum == view.)
    h_l, w_l, _, _ = layer_dims[-1]
    howo = (h_l // 2) * (w_l // 2)
    for b in range(bb):
        s_b = jnp.sum(y[b * howo:(b + 1) * howo, :], axis=0, keepdims=True)
        o_ref[b] = (jnp.dot(s_b, wh_ref[...], preferred_element_type=jnp.float32)
                    + bh_ref[...])


# ----------------------------- VMEM budgeting ------------------------------ #

def _padded_bytes(shape, itemsize):
    lead = 1
    for d in shape[:-2]:
        lead *= d
    return lead * _round_up(shape[-2], 8) * _round_up(shape[-1], 128) * itemsize


def _vmem_limit_bytes(layer_dims, bb, z_dims):
    """Per-step footprint (incl. double-buffered pipelined operands and an
    estimate of in-kernel temporaries) + 50% headroom."""
    h0, w0, c0, _ = layer_dims[0]
    total = 2 * _padded_bytes((bb, h0, w0, c0), 2)            # input block (x2 buffers)
    total += 2 * _padded_bytes((bb, 1, z_dims), 4)            # output block
    peak_tmp = 0
    for (h, w, cin, cout) in layer_dims:
        m = bb * (h // 2) * (w // 2)
        total += 2 * _padded_bytes((9 * cin, cout), 2)        # weight (const index, 2 bufs)
        total += 4 * _padded_bytes((1, cout), 4)              # scale + shift
        total += _padded_bytes((bb, h + 2, w + 2, cin), 4)    # padded activation scratch
        tmp = 3 * _padded_bytes((m, 9 * cin), 2) + 2 * _padded_bytes((m, cout), 4)
        peak_tmp = max(peak_tmp, tmp)
    c_last = layer_dims[-1][3]
    total += 2 * _padded_bytes((c_last, z_dims), 4) + 2 * _padded_bytes((1, z_dims), 4)
    est = total + peak_tmp
    return int(max(16 * 1024 * 1024, min(int(est * 1.5) + (2 << 20), 96 * 1024 * 1024)))


# -------------------------------- wrapper ----------------------------------- #

def feat_map_to_latent(params, x_nchw, *, z_dims, block_batch=1):
    """Single fused pallas_call.  block_batch images are processed per grid step
    (larger GEMM M); block_batch=1 keeps >=2 steps when B >= 2 so the input DMA
    pipelines and both v7x TensorCores get work."""
    x = jnp.transpose(x_nchw, (0, 2, 3, 1)).astype(jnp.bfloat16)   # NCHW -> NHWC, bf16 MXU feed
    B, H, W, Cin = x.shape
    bb = block_batch
    assert B % bb == 0, "block_batch must divide the batch size"

    layer_dims = []
    h, w, c = H, W, Cin
    for layer in params["convs"]:
        assert h % 2 == 0 and w % 2 == 0
        cout = layer["scale"].shape[-1]
        layer_dims.append((h, w, c, cout))
        h, w, c = h // 2, w // 2, cout
    layer_dims = tuple(layer_dims)
    c_last = layer_dims[-1][3]

    in_specs = [pl.BlockSpec((bb, H, W, Cin), lambda b: (b, 0, 0, 0))]
    inputs = [x]
    for (hh, ww, ci, co), layer in zip(layer_dims, params["convs"]):
        in_specs += [
            pl.BlockSpec((9 * ci, co), lambda b: (0, 0)),
            pl.BlockSpec((1, co), lambda b: (0, 0)),
            pl.BlockSpec((1, co), lambda b: (0, 0)),
        ]
        inputs += [layer["w"], layer["scale"], layer["shift"]]
    in_specs += [pl.BlockSpec((c_last, z_dims), lambda b: (0, 0)),
                 pl.BlockSpec((1, z_dims), lambda b: (0, 0))]
    inputs += [params["whead"], params["bhead"]]

    scratch_shapes = [pltpu.VMEM((bb, hh + 2, ww + 2, ci), jnp.float32)
                      for (hh, ww, ci, _) in layer_dims]

    out = pl.pallas_call(
        functools.partial(_fused_encoder_kernel, layer_dims=layer_dims, bb=bb),
        out_shape=jax.ShapeDtypeStruct((B, 1, z_dims), jnp.float32),
        grid=(B // bb,),
        in_specs=in_specs,
        out_specs=pl.BlockSpec((bb, 1, z_dims), lambda b: (b, 0, 0)),
        scratch_shapes=scratch_shapes,
        compiler_params=pltpu.CompilerParams(
            dimension_semantics=("parallel",),
            vmem_limit_bytes=_vmem_limit_bytes(layer_dims, bb, z_dims),
        ),
    )(*inputs)
    return out[:, 0, :]


# ------------------------------- init params -------------------------------- #

def init_params(key, imsize, nc_in, z_dims):
    max_n_down = log2_diff(imsize, 1)
    n_down = min(max_n_down, max(2, log2_diff(z_dims, nc_in)))
    eps = 1e-5

    params = {"convs": []}
    ref = {"convs": []}
    nc = nc_in
    for _ in range(n_down):
        next_nc = min(z_dims, nc * 2)
        key, kw_, kb_, kg_, kbt_ = jax.random.split(key, 5)
        fan_in = 3 * 3 * nc
        w = jax.random.normal(kw_, (3, 3, nc, next_nc), jnp.float32) / math.sqrt(fan_in)
        b = 0.01 * jax.random.normal(kb_, (next_nc,), jnp.float32)
        gamma = 1.0 + 0.1 * jax.random.normal(kg_, (next_nc,), jnp.float32)
        beta = 0.1 * jax.random.normal(kbt_, (next_nc,), jnp.float32)
        run_mean = jnp.zeros((next_nc,), jnp.float32)
        run_var = jnp.ones((next_nc,), jnp.float32)
        # Fold conv bias + eval-mode BatchNorm into one per-channel affine.
        scale = gamma / jnp.sqrt(run_var + eps)
        shift = beta + (b - run_mean) * scale
        params["convs"].append({
            # (3,3,Cin,Cout) -> (9*Cin, Cout): rows ordered (dy, dx, ci),
            # matching the kernel's tap concatenation order.
            "w": w.reshape(9 * nc, next_nc).astype(jnp.bfloat16),
            "scale": scale.reshape(1, next_nc),
            "shift": shift.reshape(1, next_nc),
        })
        ref["convs"].append({
            "w": w,
            "scale": scale.reshape(1, 1, 1, -1),
            "shift": shift.reshape(1, 1, 1, -1),
        })
        nc = next_nc

    # FullyConnectedLayer(z, z, 'linear', lr_mult=1): w ~ randn(out, in),
    # gain = 1/sqrt(in), bias = 0.  The gain AND the 1/(ho*wo) of the spatial
    # mean are folded into the weight handed to the kernel.
    key, kl = jax.random.split(key)
    w_lin = jax.random.normal(kl, (z_dims, z_dims), jnp.float32)       # torch: randn(out, in)
    w_eff = w_lin.T * (1.0 / math.sqrt(z_dims))                        # (in, out)
    final_hw = imsize // (2 ** n_down)
    params["whead"] = w_eff / float(final_hw * final_hw)
    params["bhead"] = jnp.zeros((1, z_dims), jnp.float32)

    ref["w_eff"] = w_eff
    ref["b"] = jnp.zeros((z_dims,), jnp.float32)
    return params, ref


# ------------------------- pure-JAX reference ------------------------------ #

def reference_forward(ref, x_nchw):
    """Pure-JAX reference mirroring the kernel's bf16 operand rounding."""
    def rb(v):
        return v.astype(jnp.bfloat16).astype(jnp.float32)

    x = rb(jnp.transpose(x_nchw, (0, 2, 3, 1)))
    n = len(ref["convs"])
    for i, layer in enumerate(ref["convs"]):
        z = jax.lax.conv_general_dilated(
            x, rb(layer["w"]), window_strides=(2, 2), padding=((1, 1), (1, 1)),
            dimension_numbers=("NHWC", "HWIO", "NHWC"),
            precision=jax.lax.Precision.HIGHEST)
        z = z * layer["scale"] + layer["shift"]
        sp = jnp.maximum(z, 0.0) + jnp.log1p(jnp.exp(-jnp.abs(z)))
        y = z * jnp.tanh(sp)
        x = rb(y) if i + 1 < n else y        # intermediates consumed as bf16; last stays f32
    m = jnp.mean(x, axis=(1, 2))
    return jnp.dot(m, ref["w_eff"], precision=jax.lax.Precision.HIGHEST) + ref["b"]


if __name__ == "__main__":
    imsize, nc_in, z_dims, batch = 16, 4, 32, 2   # -> n_down=3, needs_avg_pool=True
    key = jax.random.PRNGKey(0)
    kx, kp = jax.random.split(key)
    x = jax.random.normal(kx, (batch, nc_in, imsize, imsize), jnp.float32)  # NCHW like PyTorch
    params, ref = init_params(kp, imsize, nc_in, z_dims)

    fwd = jax.jit(functools.partial(feat_map_to_latent, z_dims=z_dims))
    z = fwd(params, x)
    jax.block_until_ready(z)
    assert z.shape == (batch, z_dims) and z.dtype == jnp.float32

    z_ref = reference_forward(ref, x)
    err = float(jnp.max(jnp.abs(z - z_ref)))
    assert math.isfinite(err) and err < 1e-1, f"max abs err vs reference: {err}"
    print("KERNEL_OK")
</pallas_src>

<mosaic_0001>
module attributes {stable_mosaic.version = 11 : i64} {
  func.func @_fused_encoder_kernel(%arg0: i32, %arg1: memref<1x16x16x4xbf16, #tpu.memory_space<vmem>>, %arg2: memref<36x8xbf16, #tpu.memory_space<vmem>>, %arg3: memref<1x8xf32, #tpu.memory_space<vmem>>, %arg4: memref<1x8xf32, #tpu.memory_space<vmem>>, %arg5: memref<72x16xbf16, #tpu.memory_space<vmem>>, %arg6: memref<1x16xf32, #tpu.memory_space<vmem>>, %arg7: memref<1x16xf32, #tpu.memory_space<vmem>>, %arg8: memref<144x32xbf16, #tpu.memory_space<vmem>>, %arg9: memref<1x32xf32, #tpu.memory_space<vmem>>, %arg10: memref<1x32xf32, #tpu.memory_space<vmem>>, %arg11: memref<32x32xf32, #tpu.memory_space<vmem>>, %arg12: memref<1x32xf32, #tpu.memory_space<vmem>>, %arg13: memref<1x1x32xf32, #tpu.memory_space<vmem>>, %arg14: memref<1x18x18x4xf32, #tpu.memory_space<vmem>>, %arg15: memref<1x10x10x8xf32, #tpu.memory_space<vmem>>, %arg16: memref<1x6x6x16xf32, #tpu.memory_space<vmem>>) attributes {dimension_semantics = [#tpu.dimension_semantics<parallel>], iteration_bounds = array<i64: 2>, scalar_prefetch = 0 : i64, scratch_operands = 3 : i64, tpu.core_type = #tpu.core_type<tc>, window_params = [{transform_indices = @transform_0, window_bounds = array<i64: 1, 16, 16, 4>}, {pipeline_mode = #tpu.pipeline_mode<synchronous>, transform_indices = @transform_1, window_bounds = array<i64: 36, 8>}, {pipeline_mode = #tpu.pipeline_mode<synchronous>, transform_indices = @transform_2, window_bounds = array<i64: 1, 8>}, {pipeline_mode = #tpu.pipeline_mode<synchronous>, transform_indices = @transform_3, window_bounds = array<i64: 1, 8>}, {pipeline_mode = #tpu.pipeline_mode<synchronous>, transform_indices = @transform_4, window_bounds = array<i64: 72, 16>}, {pipeline_mode = #tpu.pipeline_mode<synchronous>, transform_indices = @transform_5, window_bounds = array<i64: 1, 16>}, {pipeline_mode = #tpu.pipeline_mode<synchronous>, transform_indices = @transform_6, window_bounds = array<i64: 1, 16>}, {pipeline_mode = #tpu.pipeline_mode<synchronous>, transform_indices = @transform_7, window_bounds = array<i64: 144, 32>}, {pipeline_mode = #tpu.pipeline_mode<synchronous>, transform_indices = @transform_8, window_bounds = array<i64: 1, 32>}, {pipeline_mode = #tpu.pipeline_mode<synchronous>, transform_indices = @transform_9, window_bounds = array<i64: 1, 32>}, {pipeline_mode = #tpu.pipeline_mode<synchronous>, transform_indices = @transform_10, window_bounds = array<i64: 32, 32>}, {pipeline_mode = #tpu.pipeline_mode<synchronous>, transform_indices = @transform_11, window_bounds = array<i64: 1, 32>}, {transform_indices = @transform_12, window_bounds = array<i64: 1, 1, 32>}]} {
    %cst = arith.constant 0.000000e+00 : f32
    %0 = vector.broadcast %cst : f32 to vector<1x18x18x4xf32>
    %c0 = arith.constant 0 : index
    %c0_0 = arith.constant 0 : index
    %c0_1 = arith.constant 0 : index
    %c0_2 = arith.constant 0 : index
    %1 = vector.load %arg14[%c0, %c0_0, %c0_1, %c0_2] : memref<1x18x18x4xf32, #tpu.memory_space<vmem>>, vector<1x18x18x4xf32>
    tpu.vector_store %arg14[%c0, %c0_0, %c0_1, %c0_2], %0 {strides = array<i32>} : memref<1x18x18x4xf32, #tpu.memory_space<vmem>>, vector<1x18x18x4xf32>,
    %c0_3 = arith.constant 0 : index
    %c0_4 = arith.constant 0 : index
    %c0_5 = arith.constant 0 : index
    %c0_6 = arith.constant 0 : index
    %2 = vector.load %arg1[%c0_3, %c0_4, %c0_5, %c0_6] : memref<1x16x16x4xbf16, #tpu.memory_space<vmem>>, vector<1x16x16x4xbf16>
    %3 = arith.extf %2 : vector<1x16x16x4xbf16> to vector<1x16x16x4xf32>
    %c0_7 = arith.constant 0 : index
    %c1 = arith.constant 1 : index
    %c1_8 = arith.constant 1 : index
    %c0_9 = arith.constant 0 : index
    %4 = vector.load %arg14[%c0_7, %c1, %c1_8, %c0_9] : memref<1x18x18x4xf32, #tpu.memory_space<vmem>>, vector<1x16x16x4xf32>
    tpu.vector_store %arg14[%c0_7, %c1, %c1_8, %c0_9], %3 {strides = array<i32>} : memref<1x18x18x4xf32, #tpu.memory_space<vmem>>, vector<1x16x16x4xf32>,
    %c0_10 = arith.constant 0 : index
    %c0_11 = arith.constant 0 : index
    %c0_12 = arith.constant 0 : index
    %c0_13 = arith.constant 0 : index
    %5 = tpu.strided_load %arg14[%c0_10, %c0_11, %c0_12, %c0_13] {strides = array<i32: 1, 2, 2, 1>} : memref<1x18x18x4xf32, #tpu.memory_space<vmem>>, vector<1x8x8x4xf32>
    %6 = arith.truncf %5 : vector<1x8x8x4xf32> to vector<1x8x8x4xbf16>
    %c0_14 = arith.constant 0 : index
    %c0_15 = arith.constant 0 : index
    %c1_16 = arith.constant 1 : index
    %c0_17 = arith.constant 0 : index
    %7 = tpu.strided_load %arg14[%c0_14, %c0_15, %c1_16, %c0_17] {strides = array<i32: 1, 2, 2, 1>} : memref<1x18x18x4xf32, #tpu.memory_space<vmem>>, vector<1x8x8x4xf32>
    %8 = arith.truncf %7 : vector<1x8x8x4xf32> to vector<1x8x8x4xbf16>
    %c0_18 = arith.constant 0 : index
    %c0_19 = arith.constant 0 : index
    %c2 = arith.constant 2 : index
    %c0_20 = arith.constant 0 : index
    %9 = tpu.strided_load %arg14[%c0_18, %c0_19, %c2, %c0_20] {strides = array<i32: 1, 2, 2, 1>} : memref<1x18x18x4xf32, #tpu.memory_space<vmem>>, vector<1x8x8x4xf32>
    %10 = arith.truncf %9 : vector<1x8x8x4xf32> to vector<1x8x8x4xbf16>
    %c0_21 = arith.constant 0 : index
    %c1_22 = arith.constant 1 : index
    %c0_23 = arith.constant 0 : index
    %c0_24 = arith.constant 0 : index
    %11 = tpu.strided_load %arg14[%c0_21, %c1_22, %c0_23, %c0_24] {strides = array<i32: 1, 2, 2, 1>} : memref<1x18x18x4xf32, #tpu.memory_space<vmem>>, vector<1x8x8x4xf32>
    %12 = arith.truncf %11 : vector<1x8x8x4xf32> to vector<1x8x8x4xbf16>
    %c0_25 = arith.constant 0 : index
    %c1_26 = arith.constant 1 : index
    %c1_27 = arith.constant 1 : index
    %c0_28 = arith.constant 0 : index
    %13 = tpu.strided_load %arg14[%c0_25, %c1_26, %c1_27, %c0_28] {strides = array<i32: 1, 2, 2, 1>} : memref<1x18x18x4xf32, #tpu.memory_space<vmem>>, vector<1x8x8x4xf32>
    %14 = arith.truncf %13 : vector<1x8x8x4xf32> to vector<1x8x8x4xbf16>
    %c0_29 = arith.constant 0 : index
    %c1_30 = arith.constant 1 : index
    %c2_31 = arith.constant 2 : index
    %c0_32 = arith.constant 0 : index
    %15 = tpu.strided_load %arg14[%c0_29, %c1_30, %c2_31, %c0_32] {strides = array<i32: 1, 2, 2, 1>} : memref<1x18x18x4xf32, #tpu.memory_space<vmem>>, vector<1x8x8x4xf32>
    %16 = arith.truncf %15 : vector<1x8x8x4xf32> to vector<1x8x8x4xbf16>
    %c0_33 = arith.constant 0 : index
    %c2_34 = arith.constant 2 : index
    %c0_35 = arith.constant 0 : index
    %c0_36 = arith.constant 0 : index
    %17 = tpu.strided_load %arg14[%c0_33, %c2_34, %c0_35, %c0_36] {strides = array<i32: 1, 2, 2, 1>} : memref<1x18x18x4xf32, #tpu.memory_space<vmem>>, vector<1x8x8x4xf32>
    %18 = arith.truncf %17 : vector<1x8x8x4xf32> to vector<1x8x8x4xbf16>
    %c0_37 = arith.constant 0 : index
    %c2_38 = arith.constant 2 : index
    %c1_39 = arith.constant 1 : index
    %c0_40 = arith.constant 0 : index
    %19 = tpu.strided_load %arg14[%c0_37, %c2_38, %c1_39, %c0_40] {strides = array<i32: 1, 2, 2, 1>} : memref<1x18x18x4xf32, #tpu.memory_space<vmem>>, vector<1x8x8x4xf32>
    %20 = arith.truncf %19 : vector<1x8x8x4xf32> to vector<1x8x8x4xbf16>
    %c0_41 = arith.constant 0 : index
    %c2_42 = arith.constant 2 : index
    %c2_43 = arith.constant 2 : index
    %c0_44 = arith.constant 0 : index
    %21 = tpu.strided_load %arg14[%c0_41, %c2_42, %c2_43, %c0_44] {strides = array<i32: 1, 2, 2, 1>} : memref<1x18x18x4xf32, #tpu.memory_space<vmem>>, vector<1x8x8x4xf32>
    %22 = arith.truncf %21 : vector<1x8x8x4xf32> to vector<1x8x8x4xbf16>
    %23 = tpu.concatenate %6, %8, %10, %12, %14, %16, %18, %20, %22 in 3 : vector<1x8x8x4xbf16>, vector<1x8x8x4xbf16>, vector<1x8x8x4xbf16>, vector<1x8x8x4xbf16>, vector<1x8x8x4xbf16>, vector<1x8x8x4xbf16>, vector<1x8x8x4xbf16>, vector<1x8x8x4xbf16>, vector<1x8x8x4xbf16> -> vector<1x8x8x36xbf16>
    %24 = vector.shape_cast %23 : vector<1x8x8x36xbf16> to vector<64x36xbf16>
    %c0_45 = arith.constant 0 : index
    %c0_46 = arith.constant 0 : index
    %25 = vector.load %arg2[%c0_45, %c0_46] : memref<36x8xbf16, #tpu.memory_space<vmem>>, vector<36x8xbf16>
    %cst_47 = arith.constant dense<0.000000e+00> : vector<64x8xf32>
    %26 = tpu.matmul %24, %25, %cst_47 {dimension_numbers = #tpu.dot_dimension_numbers<[1], [0], [0], [1], [0, 0, 1, 1], [], []>} : vector<64x36xbf16>, vector<36x8xbf16>, vector<64x8xf32> -> vector<64x8xf32>
    %c0_48 = arith.constant 0 : index
    %c0_49 = arith.constant 0 : index
    %27 = vector.load %arg3[%c0_48, %c0_49] : memref<1x8xf32, #tpu.memory_space<vmem>>, vector<1x8xf32>
    %28 = vector.broadcast %27 : vector<1x8xf32> to vector<64x8xf32>
    %29 = arith.mulf %26, %28 : vector<64x8xf32>
    %c0_50 = arith.constant 0 : index
    %c0_51 = arith.constant 0 : index
    %30 = vector.load %arg4[%c0_50, %c0_51] : memref<1x8xf32, #tpu.memory_space<vmem>>, vector<1x8xf32>
    %31 = vector.broadcast %30 : vector<1x8xf32> to vector<64x8xf32>
    %32 = arith.addf %29, %31 : vector<64x8xf32>
    %cst_52 = arith.constant 2.000000e+01 : f32
    %33 = vector.broadcast %cst_52 : f32 to vector<64x8xf32>
    %34 = arith.minimumf %32, %33 : vector<64x8xf32>
    %35 = math.exp %34 : vector<64x8xf32>
    %cst_53 = arith.constant 2.000000e+00 : f32
    %36 = vector.broadcast %cst_53 : f32 to vector<64x8xf32>
    %37 = arith.addf %35, %36 : vector<64x8xf32>
    %38 = arith.mulf %35, %37 : vector<64x8xf32>
    %cst_54 = arith.constant 2.000000e+00 : f32
    %39 = vector.broadcast %cst_54 : f32 to vector<64x8xf32>
    %40 = arith.addf %38, %39 : vector<64x8xf32>
    %41 = arith.divf %38, %40 : vector<64x8xf32>
    %cst_55 = arith.constant 2.000000e+01 : f32
    %42 = vector.broadcast %cst_55 : f32 to vector<64x8xf32>
    %43 = arith.cmpf ogt, %32, %42 : vector<64x8xf32>
    %44 = arith.mulf %32, %41 : vector<64x8xf32>
    %45 = arith.select %43, %32, %44 : vector<64x8xi1>, vector<64x8xf32>
    %cst_56 = arith.constant 0.000000e+00 : f32
    %46 = vector.broadcast %cst_56 : f32 to vector<1x10x10x8xf32>
    %c0_57 = arith.constant 0 : index
    %c0_58 = arith.constant 0 : index
    %c0_59 = arith.constant 0 : index
    %c0_60 = arith.constant 0 : index
    %47 = vector.load %arg15[%c0_57, %c0_58, %c0_59, %c0_60] : memref<1x10x10x8xf32, #tpu.memory_space<vmem>>, vector<1x10x10x8xf32>
    tpu.vector_store %arg15[%c0_57, %c0_58, %c0_59, %c0_60], %46 {strides = array<i32>} : memref<1x10x10x8xf32, #tpu.memory_space<vmem>>, vector<1x10x10x8xf32>,
    %48 = vector.shape_cast %45 : vector<64x8xf32> to vector<1x8x8x8xf32>
    %c0_61 = arith.constant 0 : index
    %c1_62 = arith.constant 1 : index
    %c1_63 = arith.constant 1 : index
    %c0_64 = arith.constant 0 : index
    %49 = vector.load %arg15[%c0_61, %c1_62, %c1_63, %c0_64] : memref<1x10x10x8xf32, #tpu.memory_space<vmem>>, vector<1x8x8x8xf32>
    tpu.vector_store %arg15[%c0_61, %c1_62, %c1_63, %c0_64], %48 {strides = array<i32>} : memref<1x10x10x8xf32, #tpu.memory_space<vmem>>, vector<1x8x8x8xf32>,
    %c0_65 = arith.constant 0 : index
    %c0_66 = arith.constant 0 : index
    %c0_67 = arith.constant 0 : index
    %c0_68 = arith.constant 0 : index
    %50 = tpu.strided_load %arg15[%c0_65, %c0_66, %c0_67, %c0_68] {strides = array<i32: 1, 2, 2, 1>} : memref<1x10x10x8xf32, #tpu.memory_space<vmem>>, vector<1x4x4x8xf32>
    %51 = arith.truncf %50 : vector<1x4x4x8xf32> to vector<1x4x4x8xbf16>
    %c0_69 = arith.constant 0 : index
    %c0_70 = arith.constant 0 : index
    %c1_71 = arith.constant 1 : index
    %c0_72 = arith.constant 0 : index
    %52 = tpu.strided_load %arg15[%c0_69, %c0_70, %c1_71, %c0_72] {strides = array<i32: 1, 2, 2, 1>} : memref<1x10x10x8xf32, #tpu.memory_space<vmem>>, vector<1x4x4x8xf32>
    %53 = arith.truncf %52 : vector<1x4x4x8xf32> to vector<1x4x4x8xbf16>
    %c0_73 = arith.constant 0 : index
    %c0_74 = arith.constant 0 : index
    %c2_75 = arith.constant 2 : index
    %c0_76 = arith.constant 0 : index
    %54 = tpu.strided_load %arg15[%c0_73, %c0_74, %c2_75, %c0_76] {strides = array<i32: 1, 2, 2, 1>} : memref<1x10x10x8xf32, #tpu.memory_space<vmem>>, vector<1x4x4x8xf32>
    %55 = arith.truncf %54 : vector<1x4x4x8xf32> to vector<1x4x4x8xbf16>
    %c0_77 = arith.constant 0 : index
    %c1_78 = arith.constant 1 : index
    %c0_79 = arith.constant 0 : index
    %c0_80 = arith.constant 0 : index
    %56 = tpu.strided_load %arg15[%c0_77, %c1_78, %c0_79, %c0_80] {strides = array<i32: 1, 2, 2, 1>} : memref<1x10x10x8xf32, #tpu.memory_space<vmem>>, vector<1x4x4x8xf32>
    %57 = arith.truncf %56 : vector<1x4x4x8xf32> to vector<1x4x4x8xbf16>
    %c0_81 = arith.constant 0 : index
    %c1_82 = arith.constant 1 : index
    %c1_83 = arith.constant 1 : index
    %c0_84 = arith.constant 0 : index
    %58 = tpu.strided_load %arg15[%c0_81, %c1_82, %c1_83, %c0_84] {strides = array<i32: 1, 2, 2, 1>} : memref<1x10x10x8xf32, #tpu.memory_space<vmem>>, vector<1x4x4x8xf32>
    %59 = arith.truncf %58 : vector<1x4x4x8xf32> to vector<1x4x4x8xbf16>
    %c0_85 = arith.constant 0 : index
    %c1_86 = arith.constant 1 : index
    %c2_87 = arith.constant 2 : index
    %c0_88 = arith.constant 0 : index
    %60 = tpu.strided_load %arg15[%c0_85, %c1_86, %c2_87, %c0_88] {strides = array<i32: 1, 2, 2, 1>} : memref<1x10x10x8xf32, #tpu.memory_space<vmem>>, vector<1x4x4x8xf32>
    %61 = arith.truncf %60 : vector<1x4x4x8xf32> to vector<1x4x4x8xbf16>
    %c0_89 = arith.constant 0 : index
    %c2_90 = arith.constant 2 : index
    %c0_91 = arith.constant 0 : index
    %c0_92 = arith.constant 0 : index
    %62 = tpu.strided_load %arg15[%c0_89, %c2_90, %c0_91, %c0_92] {strides = array<i32: 1, 2, 2, 1>} : memref<1x10x10x8xf32, #tpu.memory_space<vmem>>, vector<1x4x4x8xf32>
    %63 = arith.truncf %62 : vector<1x4x4x8xf32> to vector<1x4x4x8xbf16>
    %c0_93 = arith.constant 0 : index
    %c2_94 = arith.constant 2 : index
    %c1_95 = arith.constant 1 : index
    %c0_96 = arith.constant 0 : index
    %64 = tpu.strided_load %arg15[%c0_93, %c2_94, %c1_95, %c0_96] {strides = array<i32: 1, 2, 2, 1>} : memref<1x10x10x8xf32, #tpu.memory_space<vmem>>, vector<1x4x4x8xf32>
    %65 = arith.truncf %64 : vector<1x4x4x8xf32> to vector<1x4x4x8xbf16>
    %c0_97 = arith.constant 0 : index
    %c2_98 = arith.constant 2 : index
    %c2_99 = arith.constant 2 : index
    %c0_100 = arith.constant 0 : index
    %66 = tpu.strided_load %arg15[%c0_97, %c2_98, %c2_99, %c0_100] {strides = array<i32: 1, 2, 2, 1>} : memref<1x10x10x8xf32, #tpu.memory_space<vmem>>, vector<1x4x4x8xf32>
    %67 = arith.truncf %66 : vector<1x4x4x8xf32> to vector<1x4x4x8xbf16>
    %68 = tpu.concatenate %51, %53, %55, %57, %59, %61, %63, %65, %67 in 3 : vector<1x4x4x8xbf16>, vector<1x4x4x8xbf16>, vector<1x4x4x8xbf16>, vector<1x4x4x8xbf16>, vector<1x4x4x8xbf16>, vector<1x4x4x8xbf16>, vector<1x4x4x8xbf16>, vector<1x4x4x8xbf16>, vector<1x4x4x8xbf16> -> vector<1x4x4x72xbf16>
    %69 = vector.shape_cast %68 : vector<1x4x4x72xbf16> to vector<16x72xbf16>
    %c0_101 = arith.constant 0 : index
    %c0_102 = arith.constant 0 : index
    %70 = vector.load %arg5[%c0_101, %c0_102] : memref<72x16xbf16, #tpu.memory_space<vmem>>, vector<72x16xbf16>
    %cst_103 = arith.constant dense<0.000000e+00> : vector<16x16xf32>
    %71 = tpu.matmul %69, %70, %cst_103 {dimension_numbers = #tpu.dot_dimension_numbers<[1], [0], [0], [1], [0, 0, 1, 1], [], []>} : vector<16x72xbf16>, vector<72x16xbf16>, vector<16x16xf32> -> vector<16x16xf32>
    %c0_104 = arith.constant 0 : index
    %c0_105 = arith.constant 0 : index
    %72 = vector.load %arg6[%c0_104, %c0_105] : memref<1x16xf32, #tpu.memory_space<vmem>>, vector<1x16xf32>
    %73 = vector.broadcast %72 : vector<1x16xf32> to vector<16x16xf32>
    %74 = arith.mulf %71, %73 : vector<16x16xf32>
    %c0_106 = arith.constant 0 : index
    %c0_107 = arith.constant 0 : index
    %75 = vector.load %arg7[%c0_106, %c0_107] : memref<1x16xf32, #tpu.memory_space<vmem>>, vector<1x16xf32>
    %76 = vector.broadcast %75 : vector<1x16xf32> to vector<16x16xf32>
    %77 = arith.addf %74, %76 : vector<16x16xf32>
    %cst_108 = arith.constant 2.000000e+01 : f32
    %78 = vector.broadcast %cst_108 : f32 to vector<16x16xf32>
    %79 = arith.minimumf %77, %78 : vector<16x16xf32>
    %80 = math.exp %79 : vector<16x16xf32>
    %cst_109 = arith.constant 2.000000e+00 : f32
    %81 = vector.broadcast %cst_109 : f32 to vector<16x16xf32>
    %82 = arith.addf %80, %81 : vector<16x16xf32>
    %83 = arith.mulf %80, %82 : vector<16x16xf32>
    %cst_110 = arith.constant 2.000000e+00 : f32
    %84 = vector.broadcast %cst_110 : f32 to vector<16x16xf32>
    %85 = arith.addf %83, %84 : vector<16x16xf32>
    %86 = arith.divf %83, %85 : vector<16x16xf32>
    %cst_111 = arith.constant 2.000000e+01 : f32
    %87 = vector.broadcast %cst_111 : f32 to vector<16x16xf32>
    %88 = arith.cmpf ogt, %77, %87 : vector<16x16xf32>
    %89 = arith.mulf %77, %86 : vector<16x16xf32>
    %90 = arith.select %88, %77, %89 : vector<16x16xi1>, vector<16x16xf32>
    %cst_112 = arith.constant 0.000000e+00 : f32
    %91 = vector.broadcast %cst_112 : f32 to vector<1x6x6x16xf32>
    %c0_113 = arith.constant 0 : index
    %c0_114 = arith.constant 0 : index
    %c0_115 = arith.constant 0 : index
    %c0_116 = arith.constant 0 : index
    %92 = vector.load %arg16[%c0_113, %c0_114, %c0_115, %c0_116] : memref<1x6x6x16xf32, #tpu.memory_space<vmem>>, vector<1x6x6x16xf32>
    tpu.vector_store %arg16[%c0_113, %c0_114, %c0_115, %c0_116], %91 {strides = array<i32>} : memref<1x6x6x16xf32, #tpu.memory_space<vmem>>, vector<1x6x6x16xf32>,
    %93 = vector.shape_cast %90 : vector<16x16xf32> to vector<1x4x4x16xf32>
    %c0_117 = arith.constant 0 : index
    %c1_118 = arith.constant 1 : index
    %c1_119 = arith.constant 1 : index
    %c0_120 = arith.constant 0 : index
    %94 = vector.load %arg16[%c0_117, %c1_118, %c1_119, %c0_120] : memref<1x6x6x16xf32, #tpu.memory_space<vmem>>, vector<1x4x4x16xf32>
    tpu.vector_store %arg16[%c0_117, %c1_118, %c1_119, %c0_120], %93 {strides = array<i32>} : memref<1x6x6x16xf32, #tpu.memory_space<vmem>>, vector<1x4x4x16xf32>,
    %c0_121 = arith.constant 0 : index
    %c0_122 = arith.constant 0 : index
    %c0_123 = arith.constant 0 : index
    %c0_124 = arith.constant 0 : index
    %95 = tpu.strided_load %arg16[%c0_121, %c0_122, %c0_123, %c0_124] {strides = array<i32: 1, 2, 2, 1>} : memref<1x6x6x16xf32, #tpu.memory_space<vmem>>, vector<1x2x2x16xf32>
    %96 = arith.truncf %95 : vector<1x2x2x16xf32> to vector<1x2x2x16xbf16>
    %c0_125 = arith.constant 0 : index
    %c0_126 = arith.constant 0 : index
    %c1_127 = arith.constant 1 : index
    %c0_128 = arith.constant 0 : index
    %97 = tpu.strided_load %arg16[%c0_125, %c0_126, %c1_127, %c0_128] {strides = array<i32: 1, 2, 2, 1>} : memref<1x6x6x16xf32, #tpu.memory_space<vmem>>, vector<1x2x2x16xf32>
    %98 = arith.truncf %97 : vector<1x2x2x16xf32> to vector<1x2x2x16xbf16>
    %c0_129 = arith.constant 0 : index
    %c0_130 = arith.constant 0 : index
    %c2_131 = arith.constant 2 : index
    %c0_132 = arith.constant 0 : index
    %99 = tpu.strided_load %arg16[%c0_129, %c0_130, %c2_131, %c0_132] {strides = array<i32: 1, 2, 2, 1>} : memref<1x6x6x16xf32, #tpu.memory_space<vmem>>, vector<1x2x2x16xf32>
    %100 = arith.truncf %99 : vector<1x2x2x16xf32> to vector<1x2x2x16xbf16>
    %c0_133 = arith.constant 0 : index
    %c1_134 = arith.constant 1 : index
    %c0_135 = arith.constant 0 : index
    %c0_136 = arith.constant 0 : index
    %101 = tpu.strided_load %arg16[%c0_133, %c1_134, %c0_135, %c0_136] {strides = array<i32: 1, 2, 2, 1>} : memref<1x6x6x16xf32, #tpu.memory_space<vmem>>, vector<1x2x2x16xf32>
    %102 = arith.truncf %101 : vector<1x2x2x16xf32> to vector<1x2x2x16xbf16>
    %c0_137 = arith.constant 0 : index
    %c1_138 = arith.constant 1 : index
    %c1_139 = arith.constant 1 : index
    %c0_140 = arith.constant 0 : index
    %103 = tpu.strided_load %arg16[%c0_137, %c1_138, %c1_139, %c0_140] {strides = array<i32: 1, 2, 2, 1>} : memref<1x6x6x16xf32, #tpu.memory_space<vmem>>, vector<1x2x2x16xf32>
    %104 = arith.truncf %103 : vector<1x2x2x16xf32> to vector<1x2x2x16xbf16>
    %c0_141 = arith.constant 0 : index
    %c1_142 = arith.constant 1 : index
    %c2_143 = arith.constant 2 : index
    %c0_144 = arith.constant 0 : index
    %105 = tpu.strided_load %arg16[%c0_141, %c1_142, %c2_143, %c0_144] {strides = array<i32: 1, 2, 2, 1>} : memref<1x6x6x16xf32, #tpu.memory_space<vmem>>, vector<1x2x2x16xf32>
    %106 = arith.truncf %105 : vector<1x2x2x16xf32> to vector<1x2x2x16xbf16>
    %c0_145 = arith.constant 0 : index
    %c2_146 = arith.constant 2 : index
    %c0_147 = arith.constant 0 : index
    %c0_148 = arith.constant 0 : index
    %107 = tpu.strided_load %arg16[%c0_145, %c2_146, %c0_147, %c0_148] {strides = array<i32: 1, 2, 2, 1>} : memref<1x6x6x16xf32, #tpu.memory_space<vmem>>, vector<1x2x2x16xf32>
    %108 = arith.truncf %107 : vector<1x2x2x16xf32> to vector<1x2x2x16xbf16>
    %c0_149 = arith.constant 0 : index
    %c2_150 = arith.constant 2 : index
    %c1_151 = arith.constant 1 : index
    %c0_152 = arith.constant 0 : index
    %109 = tpu.strided_load %arg16[%c0_149, %c2_150, %c1_151, %c0_152] {strides = array<i32: 1, 2, 2, 1>} : memref<1x6x6x16xf32, #tpu.memory_space<vmem>>, vector<1x2x2x16xf32>
    %110 = arith.truncf %109 : vector<1x2x2x16xf32> to vector<1x2x2x16xbf16>
    %c0_153 = arith.constant 0 : index
    %c2_154 = arith.constant 2 : index
    %c2_155 = arith.constant 2 : index
    %c0_156 = arith.constant 0 : index
    %111 = tpu.strided_load %arg16[%c0_153, %c2_154, %c2_155, %c0_156] {strides = array<i32: 1, 2, 2, 1>} : memref<1x6x6x16xf32, #tpu.memory_space<vmem>>, vector<1x2x2x16xf32>
    %112 = arith.truncf %111 : vector<1x2x2x16xf32> to vector<1x2x2x16xbf16>
    %113 = tpu.concatenate %96, %98, %100, %102, %104, %106, %108, %110, %112 in 3 : vector<1x2x2x16xbf16>, vector<1x2x2x16xbf16>, vector<1x2x2x16xbf16>, vector<1x2x2x16xbf16>, vector<1x2x2x16xbf16>, vector<1x2x2x16xbf16>, vector<1x2x2x16xbf16>, vector<1x2x2x16xbf16>, vector<1x2x2x16xbf16> -> vector<1x2x2x144xbf16>
    %114 = vector.shape_cast %113 : vector<1x2x2x144xbf16> to vector<4x144xbf16>
    %c0_157 = arith.constant 0 : index
    %c0_158 = arith.constant 0 : index
    %115 = vector.load %arg8[%c0_157, %c0_158] : memref<144x32xbf16, #tpu.memory_space<vmem>>, vector<144x32xbf16>
    %cst_159 = arith.constant dense<0.000000e+00> : vector<4x32xf32>
    %116 = tpu.matmul %114, %115, %cst_159 {dimension_numbers = #tpu.dot_dimension_numbers<[1], [0], [0], [1], [0, 0, 1, 1], [], []>} : vector<4x144xbf16>, vector<144x32xbf16>, vector<4x32xf32> -> vector<4x32xf32>
    %c0_160 = arith.constant 0 : index
    %c0_161 = arith.constant 0 : index
    %117 = vector.load %arg9[%c0_160, %c0_161] : memref<1x32xf32, #tpu.memory_space<vmem>>, vector<1x32xf32>
    %118 = vector.broadcast %117 : vector<1x32xf32> to vector<4x32xf32>
    %119 = arith.mulf %116, %118 : vector<4x32xf32>
    %c0_162 = arith.constant 0 : index
    %c0_163 = arith.constant 0 : index
    %120 = vector.load %arg10[%c0_162, %c0_163] : memref<1x32xf32, #tpu.memory_space<vmem>>, vector<1x32xf32>
    %121 = vector.broadcast %120 : vector<1x32xf32> to vector<4x32xf32>
    %122 = arith.addf %119, %121 : vector<4x32xf32>
    %cst_164 = arith.constant 2.000000e+01 : f32
    %123 = vector.broadcast %cst_164 : f32 to vector<4x32xf32>
    %124 = arith.minimumf %122, %123 : vector<4x32xf32>
    %125 = math.exp %124 : vector<4x32xf32>
    %cst_165 = arith.constant 2.000000e+00 : f32
    %126 = vector.broadcast %cst_165 : f32 to vector<4x32xf32>
    %127 = arith.addf %125, %126 : vector<4x32xf32>
    %128 = arith.mulf %125, %127 : vector<4x32xf32>
    %cst_166 = arith.constant 2.000000e+00 : f32
    %129 = vector.broadcast %cst_166 : f32 to vector<4x32xf32>
    %130 = arith.addf %128, %129 : vector<4x32xf32>
    %131 = arith.divf %128, %130 : vector<4x32xf32>
    %cst_167 = arith.constant 2.000000e+01 : f32
    %132 = vector.broadcast %cst_167 : f32 to vector<4x32xf32>
    %133 = arith.cmpf ogt, %122, %132 : vector<4x32xf32>
    %134 = arith.mulf %122, %131 : vector<4x32xf32>
    %135 = arith.select %133, %122, %134 : vector<4x32xi1>, vector<4x32xf32>
    %cst_168 = arith.constant dense<0.000000e+00> : vector<32xf32>
    %136 = vector.multi_reduction <add>, %135, %cst_168 [0] : vector<4x32xf32> to vector<32xf32>
    %137 = vector.shape_cast %136 : vector<32xf32> to vector<1x32xf32>
    %c0_169 = arith.constant 0 : index
    %c0_170 = arith.constant 0 : index
    %138 = vector.load %arg11[%c0_169, %c0_170] : memref<32x32xf32, #tpu.memory_space<vmem>>, vector<32x32xf32>
    %cst_171 = arith.constant dense<0.000000e+00> : vector<1x32xf32>
    %139 = tpu.matmul %137, %138, %cst_171 {dimension_numbers = #tpu.dot_dimension_numbers<[1], [0], [0], [1], [0, 0, 1, 1], [], []>} : vector<1x32xf32>, vector<32x32xf32>, vector<1x32xf32> -> vector<1x32xf32>
    %c0_172 = arith.constant 0 : index
    %c0_173 = arith.constant 0 : index
    %140 = vector.load %arg12[%c0_172, %c0_173] : memref<1x32xf32, #tpu.memory_space<vmem>>, vector<1x32xf32>
    %141 = arith.addf %139, %140 : vector<1x32xf32>
    %c0_174 = arith.constant 0 : index
    %c0_175 = arith.constant 0 : index
    %c0_176 = arith.constant 0 : index
    %142 = vector.load %arg13[%c0_174, %c0_175, %c0_176] : memref<1x1x32xf32, #tpu.memory_space<vmem>>, vector<1x1x32xf32>
    %143 = vector.shape_cast %142 : vector<1x1x32xf32> to vector<1x32xf32>
    %144 = vector.shape_cast %141 : vector<1x32xf32> to vector<1x1x32xf32>
    tpu.vector_store %arg13[%c0_174, %c0_175, %c0_176], %144 {strides = array<i32>} : memref<1x1x32xf32, #tpu.memory_space<vmem>>, vector<1x1x32xf32>,
    return
  }
  func.func @transform_0(%arg0: i32) -> (i32, i32, i32, i32) {
    %c0_i32 = arith.constant 0 : i32
    %c0_i32_0 = arith.constant 0 : i32
    %c0_i32_1 = arith.constant 0 : i32
    %c0_i32_2 = arith.constant 0 : i32
    return %arg0, %c0_i32, %c0_i32_0, %c0_i32_1 : i32, i32, i32, i32
  }
  func.func @transform_1(%arg0: i32) -> (i32, i32) {
    %c0_i32 = arith.constant 0 : i32
    %c0_i32_0 = arith.constant 0 : i32
    %c0_i32_1 = arith.constant 0 : i32
    return %c0_i32, %c0_i32_0 : i32, i32
  }
  func.func @transform_2(%arg0: i32) -> (i32, i32) {
    %c0_i32 = arith.constant 0 : i32
    %c0_i32_0 = arith.constant 0 : i32
    %c0_i32_1 = arith.constant 0 : i32
    return %c0_i32, %c0_i32_0 : i32, i32
  }
  func.func @transform_3(%arg0: i32) -> (i32, i32) {
    %c0_i32 = arith.constant 0 : i32
    %c0_i32_0 = arith.constant 0 : i32
    %c0_i32_1 = arith.constant 0 : i32
    return %c0_i32, %c0_i32_0 : i32, i32
  }
  func.func @transform_4(%arg0: i32) -> (i32, i32) {
    %c0_i32 = arith.constant 0 : i32
    %c0_i32_0 = arith.constant 0 : i32
    %c0_i32_1 = arith.constant 0 : i32
    return %c0_i32, %c0_i32_0 : i32, i32
  }
  func.func @transform_5(%arg0: i32) -> (i32, i32) {
    %c0_i32 = arith.constant 0 : i32
    %c0_i32_0 = arith.constant 0 : i32
    %c0_i32_1 = arith.constant 0 : i32
    return %c0_i32, %c0_i32_0 : i32, i32
  }
  func.func @transform_6(%arg0: i32) -> (i32, i32) {
    %c0_i32 = arith.constant 0 : i32
    %c0_i32_0 = arith.constant 0 : i32
    %c0_i32_1 = arith.constant 0 : i32
    return %c0_i32, %c0_i32_0 : i32, i32
  }
  func.func @transform_7(%arg0: i32) -> (i32, i32) {
    %c0_i32 = arith.constant 0 : i32
    %c0_i32_0 = arith.constant 0 : i32
    %c0_i32_1 = arith.constant 0 : i32
    return %c0_i32, %c0_i32_0 : i32, i32
  }
  func.func @transform_8(%arg0: i32) -> (i32, i32) {
    %c0_i32 = arith.constant 0 : i32
    %c0_i32_0 = arith.constant 0 : i32
    %c0_i32_1 = arith.constant 0 : i32
    return %c0_i32, %c0_i32_0 : i32, i32
  }
  func.func @transform_9(%arg0: i32) -> (i32, i32) {
    %c0_i32 = arith.constant 0 : i32
    %c0_i32_0 = arith.constant 0 : i32
    %c0_i32_1 = arith.constant 0 : i32
    return %c0_i32, %c0_i32_0 : i32, i32
  }
  func.func @transform_10(%arg0: i32) -> (i32, i32) {
    %c0_i32 = arith.constant 0 : i32
    %c0_i32_0 = arith.constant 0 : i32
    %c0_i32_1 = arith.constant 0 : i32
    return %c0_i32, %c0_i32_0 : i32, i32
  }
  func.func @transform_11(%arg0: i32) -> (i32, i32) {
    %c0_i32 = arith.constant 0 : i32
    %c0_i32_0 = arith.constant 0 : i32
    %c0_i32_1 = arith.constant 0 : i32
    return %c0_i32, %c0_i32_0 : i32, i32
  }
  func.func @transform_12(%arg0: i32) -> (i32, i32, i32) {
    %c0_i32 = arith.constant 0 : i32
    %c0_i32_0 = arith.constant 0 : i32
    %c0_i32_1 = arith.constant 0 : i32
    return %arg0, %c0_i32, %c0_i32_0 : i32, i32, i32
  }
}

</mosaic_0001>

<bundles_post_ra>
// kernel: feat_map_to_latent.1
= control target key start
LH: loop header
LB: loop body
LE: loop exit
PB: predicated region body
PF: predicated region fallthrough
CT: control target
= control target key end

     0   :  { %s3521_s0 = inlined_call_operand.vmem [shape: bf16[2,16,16,4], index: 0, kind: input, shape index: {}]   ;;  %s3522_s1 = inlined_call_operand.vmem [shape: bf16[36,8], index: 1, kind: input, shape index: {}]   ;;  %s3523_s2 = inlined_call_operand.vmem [shape: f32[1,8], index: 2, kind: input, shape index: {}]   ;;  %s3524_s3 = inlined_call_operand.vmem [shape: f32[1,8], index: 3, kind: input, shape index: {}]   ;;  %s3525_s4 = inlined_call_operand.vmem [shape: bf16[72,16], index: 4, kind: input, shape index: {}]   ;;  %s3526_s5 = inlined_call_operand.vmem [shape: f32[1,16], index: 5, kind: input, shape index: {}]   ;;  %s3527_s6 = inlined_call_operand.vmem [shape: f32[1,16], index: 6, kind: input, shape index: {}]   ;;  %s3528_s7 = inlined_call_operand.vmem [shape: bf16[144,32], index: 7, kind: input, shape index: {}]   ;;  %s3529_s8 = inlined_call_operand.vmem [shape: f32[1,32], index: 8, kind: input, shape index: {}]   ;;  %s3530_s9 = inlined_call_operand.vmem [shape: f32[1,32], index: 9, kind: input, shape index: {}]   ;;  %s3531_s10 = inlined_call_operand.vmem [shape: f32[32,32], index: 10, kind: input, shape index: {}]   ;;  %s3532_s11 = inlined_call_operand.vmem [shape: f32[1,32], index: 11, kind: input, shape index: {}]   ;;  %s3533_s12 = inlined_call_operand.hbm [shape: f32[2,1,32], index: 12, kind: output, shape index: {}]  }
   0x1   :  { %3544 = sst [smem:[#allocation8_spill]] %s3521_s0 }
   0x2   :  { %3545 = sst [smem:[#allocation9_spill]] %s3522_s1 }
   0x3   :  { %17 = vsyncpa [#allocation6], 0 }
   0x4   :  { %19 = vsyncpa [#allocation6 + $0x1], 0  ;;  %s2843_s21 = smov 0   ;;  %s2845_s22 = smov 0  }
   0x5   :  { %s2847_s23 = smov 0   ;;  %s2849_s24 = smov 0  }
   0x6 LB: > { %s2864_s25 = sadd.s32 4294967295, %s2754_s24   ;;  %s2384_s26 = sadd.s32 4294967294, %s2754_s24   ;;  %s2754_s24 = sphi %s2849_s24, %s3558_s24   ;;  %s2750_s23 = sphi %s2847_s23, %s3557_s23   ;;  %s2746_s22 = sphi %s2845_s22, %s3556_s22   ;;  %s2742_s21 = sphi %s2843_s21, %s3555_s21  }
   0x7   : > { %s2868_s27 = sadd.s32 1, %s2754_s24   ;;  %s289_s28 = sadd.s32 1, %s2750_s23 }
   0x8   : > { %s286_s29 = ssub.s32 %s2754_s24, %s2868_s27  ;;  %p299_p0 = scmp.ne.s32.totalorder %s2750_s23, %s2746_s22 }
   0x9   : > { %p287_p1 = scmp.eq.s32.totalorder %s286_s29, 0  ;;  %p300_p2 = scmp.eq.s32.totalorder %s2864_s25, 1 }
   0xa   : > { %p305_p3 = scmp.ne.s32.totalorder %s2746_s22, %s2742_s21  ;;  %p306_p4 = scmp.eq.s32.totalorder %s2384_s26, 1 }
   0xb   : > { %s2879_s30 = scalar_select %p287_p1, %s2750_s23, %s289_s28  }
   0xc   : > { %p2881_p5 = por %p300_p2, %p299_p0  ;;  %p2885_p6 = por %p306_p4, %p305_p3 }
   0xd   : > { %p2387_p7 = scmp.ge.s32.totalorder %s2754_s24, 1  ;;  %p365_p8 = scmp.lt.s32.totalorder %s2754_s24, 3 }
   0xf   : > { %p366_p9 = pnand %p2387_p7, %p365_p8 }
  0x10   : > { %vm412_vm0 = vcmask (!%p366_p9), 31744   ;;  %vm415_vm1 = vcmask (!%p366_p9), 25600   ;;  %vm995_vm2 = vcmask (!%p366_p9), 64512   ;;  %v2756_v0 = vmov (!%p366_p9), 0.0   ;;  %p406_p10 = scmp.lt.s32.totalorder (!%p366_p9), %s2864_s25, 1  ;;  %s3548_s0 = sld [smem:[#allocation8_spill]] (!%p366_p9) }
  0x11   : > { %369 = sbr.rel (%p366_p9) target bundleno = 1631 (0x65f), region = 68  ;;  %413 = vst.msk [vmem:[#allocation2] sm:$0xff] (!%p366_p9), %vm412_vm0, %v2756_v0  ;;  %414 = vst.msk [vmem:[#allocation2 + $0x8] sm:$0xff] (!%p366_p9), %vm412_vm0, %v2756_v0  ;;  %s2757_s20 = smov (!%p366_p9), 4   ;;  %vm1167_vm3 = vcmask (!%p366_p9), 1041408   ;;  %vm1012_vm4 = vcmask (!%p366_p9), 97280  }
  0x12   : > { %417 = vst.msk [vmem:[#allocation2 + $0x18] sm:$0xff] (!%p366_p9), %vm412_vm0, %v2756_v0  ;;  %418 = vst.msk [vmem:[#allocation2 + $0x20] sm:$0xff] (!%p366_p9), %vm412_vm0, %v2756_v0  ;;  %s2758_s26 = smov (!%p366_p9), 8   ;;  %s3538_s28 = smov (!%p366_p9), 12   ;;  %vm1029_vm5 = vcmask (!%p366_p9), 130048   ;;  %vm1046_vm6 = vcmask (!%p366_p9), 162816  }
  0x13   : > { %420 = vst.msk [vmem:[#allocation2 + $0x30] sm:$0xff] (!%p366_p9), %vm412_vm0, %v2756_v0  ;;  %421 = vst.msk [vmem:[#allocation2 + $0x38] sm:$0xff] (!%p366_p9), %vm412_vm0, %v2756_v0  ;;  %s3536_s29 = smov (!%p366_p9), 16   ;;  %s3549_s1 = sld [smem:[#allocation9_spill]] (!%p366_p9)  ;;  %vm1063_vm7 = vcmask (!%p366_p9), 195584   ;;  %vm1080_vm8 = vcmask (!%p366_p9), 228352  }
  0x14   : > { %423 = vst.msk [vmem:[#allocation2 + $0x48] sm:$0xff] (!%p366_p9), %vm412_vm0, %v2756_v0  ;;  %424 = vst.msk [vmem:[#allocation2 + $0x50] sm:$0xff] (!%p366_p9), %vm412_vm0, %v2756_v0  ;;  %vm1097_vm9 = vcmask (!%p366_p9), 261120   ;;  %vm1154_vm10 = vcmask (!%p366_p9), 293888   ;;  %vm1355_vm11 = vcmask (!%p366_p9), 58368   ;;  %s2767_s17 = smov (!%p366_p9), 56  }
  0x15   : > { %426 = vst.msk [vmem:[#allocation2 + $0x60] sm:$0xff] (!%p366_p9), %vm412_vm0, %v2756_v0  ;;  %427 = vst.msk [vmem:[#allocation2 + $0x68] sm:$0xff] (!%p366_p9), %vm412_vm0, %v2756_v0  ;;  %s3540_s18 = smov (!%p366_p9), 64  }
  0x16   : > { %429 = vst.msk [vmem:[#allocation2 + $0x78] sm:$0xff] (!%p366_p9), %vm412_vm0, %v2756_v0  ;;  %430 = vst.msk [vmem:[#allocation2 + $0x80] sm:$0xff] (!%p366_p9), %vm412_vm0, %v2756_v0 }
  0x17   : > { %432 = vst.msk [vmem:[#allocation2 + $0x90] sm:$0xff] (!%p366_p9), %vm412_vm0, %v2756_v0  ;;  %433 = vst.msk [vmem:[#allocation2 + $0x98] sm:$0xff] (!%p366_p9), %vm412_vm0, %v2756_v0 }
  0x18   : > { %435 = vst.msk [vmem:[#allocation2 + $0xa8] sm:$0xff] %vm412_vm0, %v2756_v0  ;;  %436 = vst.msk [vmem:[#allocation2 + $0xb0] sm:$0xff] %vm412_vm0, %v2756_v0  ;;  %s407_s15 = scalar_select %p406_p10, %s2864_s25, 1  ;;  %v589_v4 = vld [vmem:[#allocation2 + $0x1] ss:$2 sm:$0xff] }
  0x19   : > { %438 = vst.msk [vmem:[#allocation2 + $0xc0] sm:$0xff] %vm412_vm0, %v2756_v0  ;;  %439 = vst.msk [vmem:[#allocation2 + $0xc8] sm:$0xff] %vm412_vm0, %v2756_v0  ;;  %v604_v11 = vpack.c.bf16 %v589_v4, %v589_v4 }
  0x1a   : > { %441 = vst.msk [vmem:[#allocation2 + $0xd8] sm:$0xff] %vm412_vm0, %v2756_v0  ;;  %442 = vst.msk [vmem:[#allocation2 + $0xe0] sm:$0xff] %vm412_vm0, %v2756_v0  ;;  %s2427_s16 = sshll.u32 %s407_s15, 7  ;;  %s3534_s15 = smov 20  }
  0x1b   : > { %444 = vst.msk [vmem:[#allocation2 + $0xf0] sm:$0xff] %vm412_vm0, %v2756_v0  ;;  %445 = vst.msk [vmem:[#allocation2 + $0xf8] sm:$0xff] %vm412_vm0, %v2756_v0  ;;  %s3016_s19 = scalar_lea.vmem %s3548_s0, %s2427_s16  ;;  %787 = vrot.lane.b32.xlu0 %v604_v11, %s2757_s20  ;;  %s2762_s16 = smov 24  }
  0x1c   : > { %447 = vst.msk [vmem:[#allocation2 + $0x108] sm:$0xff] %vm412_vm0, %v2756_v0  ;;  %448 = vst.msk [vmem:[#allocation2 + $0x110] sm:$0xff] %vm412_vm0, %v2756_v0  ;;  %v2494_v1 = vld [vmem:[%s3016_s19 + $0x18] sm:$0xff]   ;;  %v2492_v2 = vld [vmem:[%s3016_s19 + $0x8] sm:$0xff]  }
  0x1d   : > { %450 = vst.msk [vmem:[#allocation2 + $0x120] sm:$0xff] %vm412_vm0, %v2756_v0  ;;  %451 = vst.msk [vmem:[#allocation2 + $0x128] sm:$0xff] %vm412_vm0, %v2756_v0  ;;  %v2496_v3 = vld [vmem:[%s3016_s19 + $0x28] sm:$0xff]   ;;  %v2442_v6 = vunpack.c.l.bf16 %v2494_v1  ;;  %v2443_v7 = vunpack.c.h.bf16 %v2494_v1  ;;  %v2434_v8 = vunpack.c.l.bf16 %v2492_v2  ;;  %v2435_v9 = vunpack.c.h.bf16 %v2492_v2  ;;  %v2429_v10 = vld [vmem:[%s3016_s19] sm:$0xff]  }
  0x1e   : > { %453 = vst.msk [vmem:[#allocation2 + $0x138] sm:$0xff] %vm412_vm0, %v2756_v0  ;;  %454 = vst.msk [vmem:[#allocation2 + $0x140] sm:$0xff] %vm412_vm0, %v2756_v0  ;;  %v2450_v13 = vunpack.c.l.bf16 %v2496_v3  ;;  %v2451_v14 = vunpack.c.h.bf16 %v2496_v3  ;;  %v2495_v15 = vld [vmem:[%s3016_s19 + $0x20] sm:$0xff]   ;;  %v2493_v16 = vld [vmem:[%s3016_s19 + $0x10] sm:$0xff]   ;;  %v2430_v18 = vunpack.c.l.bf16 %v2429_v10  ;;  %v2431_v19 = vunpack.c.h.bf16 %v2429_v10 }
  0x1f   : > { %456 = vst.msk [vmem:[#allocation2 + $0x150] sm:$0xff] %vm412_vm0, %v2756_v0  ;;  %457 = vst.msk [vmem:[#allocation2 + $0x158] sm:$0xff] %vm412_vm0, %v2756_v0  ;;  %v2497_v17 = vld [vmem:[%s3016_s19 + $0x30] sm:$0xff]   ;;  %v2446_v20 = vunpack.c.l.bf16 %v2495_v15  ;;  %v2447_v21 = vunpack.c.h.bf16 %v2495_v15  ;;  %v2498_v22 = vld [vmem:[%s3016_s19 + $0x38] sm:$0xff]   ;;  %v2438_v25 = vunpack.c.l.bf16 %v2493_v16  ;;  %v2439_v26 = vunpack.c.h.bf16 %v2493_v16 }
  0x20   : > { %459 = vst.msk [vmem:[#allocation2 + $0x168] sm:$0xff] %vm412_vm0, %v2756_v0  ;;  %460 = vst.msk [vmem:[#allocation2 + $0x170] sm:$0xff] %vm412_vm0, %v2756_v0  ;;  %v2500_v23 = vld [vmem:[%s3016_s19 + $0x48] sm:$0xff]   ;;  %v2502_v24 = vld [vmem:[%s3016_s19 + $0x58] sm:$0xff]   ;;  %v2454_v27 = vunpack.c.l.bf16 %v2497_v17  ;;  %v2455_v28 = vunpack.c.h.bf16 %v2497_v17  ;;  %v2458_v32 = vunpack.c.l.bf16 %v2498_v22  ;;  %v2459_v33 = vunpack.c.h.bf16 %v2498_v22 }
  0x21   : > { %462 = vst.msk [vmem:[#allocation2 + $0x180] sm:$0xff] %vm412_vm0, %v2756_v0  ;;  %463 = vst.msk [vmem:[#allocation2 + $0x188] sm:$0xff] %vm412_vm0, %v2756_v0  ;;  %v2504_v29 = vld [vmem:[%s3016_s19 + $0x68] sm:$0xff]   ;;  %v2499_v30 = vld [vmem:[%s3016_s19 + $0x40] sm:$0xff]   ;;  %v2466_v34 = vunpack.c.l.bf16 %v2500_v23  ;;  %v2467_v35 = vunpack.c.h.bf16 %v2500_v23  ;;  %v2474_v38 = vunpack.c.l.bf16 %v2502_v24  ;;  %v2475_v39 = vunpack.c.h.bf16 %v2502_v24 }
  0x22   : > { %416 = vst.msk [vmem:[#allocation2 + $0x10] sm:$0x3] %vm415_vm1, %v2756_v0  ;;  %419 = vst.msk [vmem:[#allocation2 + $0x28] sm:$0x3] %vm415_vm1, %v2756_v0  ;;  %v2503_v31 = vld [vmem:[%s3016_s19 + $0x60] sm:$0xff]   ;;  %v2501_v36 = vld [vmem:[%s3016_s19 + $0x50] sm:$0xff]   ;;  %v2482_v40 = vunpack.c.l.bf16 %v2504_v29  ;;  %v2483_v41 = vunpack.c.h.bf16 %v2504_v29  ;;  %v2462_v43 = vunpack.c.l.bf16 %v2499_v30  ;;  %v2463_v44 = vunpack.c.h.bf16 %v2499_v30 }
  0x23   : > { %422 = vst.msk [vmem:[#allocation2 + $0x40] sm:$0x3] %vm415_vm1, %v2756_v0  ;;  %425 = vst.msk [vmem:[#allocation2 + $0x58] sm:$0x3] %vm415_vm1, %v2756_v0  ;;  %v2505_v37 = vld [vmem:[%s3016_s19 + $0x70] sm:$0xff]   ;;  %v2506_v42 = vld [vmem:[%s3016_s19 + $0x78] sm:$0xff]   ;;  %v2478_v45 = vunpack.c.l.bf16 %v2503_v31  ;;  %v2479_v46 = vunpack.c.h.bf16 %v2503_v31  ;;  %v2470_v47 = vunpack.c.l.bf16 %v2501_v36  ;;  %v2471_v48 = vunpack.c.h.bf16 %v2501_v36 }
  0x24   : > { %428 = vst.msk [vmem:[#allocation2 + $0x70] sm:$0x3] %vm415_vm1, %v2756_v0  ;;  %431 = vst.msk [vmem:[#allocation2 + $0x88] sm:$0x3] %vm415_vm1, %v2756_v0  ;;  %v2486_v49 = vunpack.c.l.bf16 %v2505_v37  ;;  %v2487_v50 = vunpack.c.h.bf16 %v2505_v37  ;;  %v2490_v51 = vunpack.c.l.bf16 %v2506_v42  ;;  %v2491_v52 = vunpack.c.h.bf16 %v2506_v42  ;;  %v2631_v36 = vld [vmem:[%s3549_s1] sm:$0xff]   ;;  %s2763_s19 = smov 28  }
  0x25   : > { %434 = vst.msk [vmem:[#allocation2 + $0xa0] sm:$0x3] %vm415_vm1, %v2756_v0  ;;  %437 = vst.msk [vmem:[#allocation2 + $0xb8] sm:$0x3] %vm415_vm1, %v2756_v0  ;;  %2525 = vmatprep.subr.bf16.mxu1 %v2631_v36 }
  0x26   : > { %440 = vst.msk [vmem:[#allocation2 + $0xd0] sm:$0x3] %vm415_vm1, %v2756_v0  ;;  %443 = vst.msk [vmem:[#allocation2 + $0xe8] sm:$0x3] %vm415_vm1, %v2756_v0  ;;  %2526 = vmatpush3.bf16.msra.mxu1 %v2631_v36 }
  0x27   : > { %446 = vst.msk [vmem:[#allocation2 + $0x100] sm:$0x3] %vm415_vm1, %v2756_v0  ;;  %449 = vst.msk [vmem:[#allocation2 + $0x118] sm:$0x3] %vm415_vm1, %v2756_v0 }
  0x28   : > { %452 = vst.msk [vmem:[#allocation2 + $0x130] sm:$0x3] %vm415_vm1, %v2756_v0  ;;  %455 = vst.msk [vmem:[#allocation2 + $0x148] sm:$0x3] %vm415_vm1, %v2756_v0 }
  0x29   : > { %458 = vst.msk [vmem:[#allocation2 + $0x160] sm:$0x3] %vm415_vm1, %v2756_v0  ;;  %461 = vst.msk [vmem:[#allocation2 + $0x178] sm:$0x3] %vm415_vm1, %v2756_v0  ;;  %v3021_v5 = vld [vmem:[#allocation2 + $0x2] ss:$2 sm:$0xff] }
  0x2a   : > { %464 = vst.msk [vmem:[#allocation2 + $0x190] sm:$0x3] %vm415_vm1, %v2756_v0  ;;  %v628_v12 = vpack.c.bf16 %v3021_v5, %v3021_v5 }
  0x2b   : > { %1354 = vst.msk [vmem:[#allocation3] sm:$0xff] %vm995_vm2, %v2756_v0  ;;  %1357 = vst.msk [vmem:[#allocation3 + $0x10] sm:$0xff] %vm995_vm2, %v2756_v0 }
  0x2c   : > { %1359 = vst.msk [vmem:[#allocation3 + $0x20] sm:$0xff] %vm995_vm2, %v2756_v0  ;;  %1361 = vst.msk [vmem:[#allocation3 + $0x30] sm:$0xff] %vm995_vm2, %v2756_v0  ;;  %811 = vrot.lane.b32.xlu0 %v628_v12, %s2758_s26 }
  0x2d   : > { %1363 = vst.msk [vmem:[#allocation3 + $0x40] sm:$0xff] %vm995_vm2, %v2756_v0  ;;  %1365 = vst.msk [vmem:[#allocation3 + $0x50] sm:$0xff] %vm995_vm2, %v2756_v0 }
  0x2e   : > { %1367 = vst.msk [vmem:[#allocation3 + $0x60] sm:$0xff] %vm995_vm2, %v2756_v0  ;;  %1369 = vst.msk [vmem:[#allocation3 + $0x70] sm:$0xff] %vm995_vm2, %v2756_v0 }
  0x2f   : > { %1371 = vst.msk [vmem:[#allocation3 + $0x80] sm:$0xff] %vm995_vm2, %v2756_v0 }
  0x30   : > { %539 = vst.msk [vmem:[#allocation2 + $0x61] sm:$0xff] %vm412_vm0, %v2442_v6  ;;  %540 = vst.msk [vmem:[#allocation2 + $0x69] sm:$0xff] %vm412_vm0, %v2443_v7 }
  0x31   : > { %535 = vst.msk [vmem:[#allocation2 + $0x31] sm:$0xff] %vm412_vm0, %v2434_v8  ;;  %536 = vst.msk [vmem:[#allocation2 + $0x39] sm:$0xff] %vm412_vm0, %v2435_v9 }
  0x32   : > { %543 = vst.msk [vmem:[#allocation2 + $0x91] sm:$0xff] %vm412_vm0, %v2450_v13  ;;  %544 = vst.msk [vmem:[#allocation2 + $0x99] sm:$0xff] %vm412_vm0, %v2451_v14 }
  0x33   : > { %533 = vst.msk [vmem:[#allocation2 + $0x19] sm:$0xff] %vm412_vm0, %v2430_v18  ;;  %534 = vst.msk [vmem:[#allocation2 + $0x21] sm:$0xff] %vm412_vm0, %v2431_v19 }
  0x34   : > { %541 = vst.msk [vmem:[#allocation2 + $0x79] sm:$0xff] %vm412_vm0, %v2446_v20  ;;  %542 = vst.msk [vmem:[#allocation2 + $0x81] sm:$0xff] %vm412_vm0, %v2447_v21 }
  0x35   : > { %537 = vst.msk [vmem:[#allocation2 + $0x49] sm:$0xff] %vm412_vm0, %v2438_v25  ;;  %538 = vst.msk [vmem:[#allocation2 + $0x51] sm:$0xff] %vm412_vm0, %v2439_v26 }
  0x36   : > { %545 = vst.msk [vmem:[#allocation2 + $0xa9] sm:$0xff] %vm412_vm0, %v2454_v27  ;;  %546 = vst.msk [vmem:[#allocation2 + $0xb1] sm:$0xff] %vm412_vm0, %v2455_v28 }
  0x37   : > { %547 = vst.msk [vmem:[#allocation2 + $0xc1] sm:$0xff] %vm412_vm0, %v2458_v32  ;;  %548 = vst.msk [vmem:[#allocation2 + $0xc9] sm:$0xff] %vm412_vm0, %v2459_v33  ;;  %v593_v53 = vld [vmem:[#allocation2 + $0x61] ss:$2 sm:$0xff]  ;;  %v617_v55 = vld [vmem:[#allocation2 + $0x62] ss:$2 sm:$0xff] }
  0x38   : > { %551 = vst.msk [vmem:[#allocation2 + $0xf1] sm:$0xff] %vm412_vm0, %v2466_v34  ;;  %552 = vst.msk [vmem:[#allocation2 + $0xf9] sm:$0xff] %vm412_vm0, %v2467_v35  ;;  %v591_v54 = vld [vmem:[#allocation2 + $0x31] ss:$2 sm:$0xff]  ;;  %v606_v56 = vpack.c.bf16 %v593_v53, %v593_v53  ;;  %v630_v60 = vpack.c.bf16 %v617_v55, %v617_v55  ;;  %v615_v61 = vld [vmem:[#allocation2 + $0x32] ss:$2 sm:$0xff] }
  0x39   : > { %555 = vst.msk [vmem:[#allocation2 + $0x121] sm:$0xff] %vm412_vm0, %v2474_v38  ;;  %556 = vst.msk [vmem:[#allocation2 + $0x129] sm:$0xff] %vm412_vm0, %v2475_v39  ;;  %v605_v57 = vpack.c.bf16 %v591_v54, %v591_v54  ;;  %v595_v58 = vld [vmem:[#allocation2 + $0x91] ss:$2 sm:$0xff]  ;;  %v629_v63 = vpack.c.bf16 %v615_v61, %v615_v61  ;;  %v619_v2 = vld [vmem:[#allocation2 + $0x92] ss:$2 sm:$0xff] }
  0x3a   : > { %559 = vst.msk [vmem:[#allocation2 + $0x151] sm:$0xff] %vm412_vm0, %v2482_v40  ;;  %560 = vst.msk [vmem:[#allocation2 + $0x159] sm:$0xff] %vm412_vm0, %v2483_v41  ;;  %791 = vrot.lane.b32.xlu1 %v606_v56, %s2757_s20  ;;  %v607_v59 = vpack.c.bf16 %v595_v58, %v595_v58  ;;  %v636_v62 = vld [vmem:[#allocation2 + $0x18] ss:$2 sm:$0xff]  ;;  %v631_v4 = vpack.c.bf16 %v619_v2, %v619_v2  ;;  %v660_v7 = vld [vmem:[#allocation2 + $0x19] ss:$2 sm:$0xff] }
  0x3b   : > { %549 = vst.msk [vmem:[#allocation2 + $0xd9] sm:$0xff] %vm412_vm0, %v2462_v43  ;;  %550 = vst.msk [vmem:[#allocation2 + $0xe1] sm:$0xff] %vm412_vm0, %v2463_v44  ;;  %789 = vrot.lane.b32.xlu0 %v605_v57, %s2757_s20  ;;  %v651_v1 = vpack.c.bf16 %v636_v62, %v636_v62  ;;  %v640_v3 = vld [vmem:[#allocation2 + $0x78] ss:$2 sm:$0xff]  ;;  %v675_v9 = vpack.c.bf16 %v660_v7, %v660_v7  ;;  %v664_v11 = vld [vmem:[#allocation2 + $0x79] ss:$2 sm:$0xff] }
  0x3c   : > { %557 = vst.msk [vmem:[#allocation2 + $0x139] sm:$0xff] %vm412_vm0, %v2478_v45  ;;  %558 = vst.msk [vmem:[#allocation2 + $0x141] sm:$0xff] %vm412_vm0, %v2479_v46  ;;  %v653_v5 = vpack.c.bf16 %v640_v3, %v640_v3  ;;  %v638_v6 = vld [vmem:[#allocation2 + $0x48] ss:$2 sm:$0xff]  ;;  %v677_v13 = vpack.c.bf16 %v664_v11, %v664_v11  ;;  %v662_v14 = vld [vmem:[#allocation2 + $0x49] ss:$2 sm:$0xff] }
  0x3d   : > { %553 = vst.msk [vmem:[#allocation2 + $0x109] sm:$0xff] %vm412_vm0, %v2470_v47  ;;  %554 = vst.msk [vmem:[#allocation2 + $0x111] sm:$0xff] %vm412_vm0, %v2471_v48  ;;  %v652_v8 = vpack.c.bf16 %v638_v6, %v638_v6  ;;  %v642_v10 = vld [vmem:[#allocation2 + $0xa8] ss:$2 sm:$0xff]  ;;  %v666_v16 = vld [vmem:[#allocation2 + $0xa9] ss:$2 sm:$0xff]  ;;  %v676_v17 = vpack.c.bf16 %v662_v14, %v662_v14 }
  0x3e   : > { %561 = vst.msk [vmem:[#allocation2 + $0x169] sm:$0xff] %vm412_vm0, %v2486_v49  ;;  %562 = vst.msk [vmem:[#allocation2 + $0x171] sm:$0xff] %vm412_vm0, %v2487_v50  ;;  %793 = vrot.lane.b32.xlu1 %v607_v59, %s2757_s20  ;;  %v654_v12 = vpack.c.bf16 %v642_v10, %v642_v10  ;;  %v684_v15 = vld [vmem:[#allocation2 + $0x1a] ss:$2 sm:$0xff]  ;;  %v678_v20 = vpack.c.bf16 %v666_v16, %v666_v16  ;;  %v686_v22 = vld [vmem:[#allocation2 + $0x4a] ss:$2 sm:$0xff] }
  0x3f   : > { %563 = vst.msk [vmem:[#allocation2 + $0x181] sm:$0xff] %vm412_vm0, %v2490_v51  ;;  %564 = vst.msk [vmem:[#allocation2 + $0x189] sm:$0xff] %vm412_vm0, %v2491_v52  ;;  %815 = vrot.lane.b32.xlu0 %v630_v60, %s2758_s26  ;;  %v699_v18 = vpack.c.bf16 %v684_v15, %v684_v15  ;;  %v688_v19 = vld [vmem:[#allocation2 + $0x7a] ss:$2 sm:$0xff]  ;;  %v700_v24 = vpack.c.bf16 %v686_v22, %v686_v22  ;;  %v690_v26 = vld [vmem:[#allocation2 + $0xaa] ss:$2 sm:$0xff] }
  0x40   : > { %v701_v21 = vpack.c.bf16 %v688_v19, %v688_v19  ;;  %v708_v23 = vld [vmem:[#allocation2 + $0x30] ss:$2 sm:$0xff]  ;;  %v702_v28 = vpack.c.bf16 %v690_v26, %v690_v26  ;;  %v710_v30 = vld [vmem:[#allocation2 + $0x60] ss:$2 sm:$0xff]  ;;  %v732_v31 = vld [vmem:[#allocation2 + $0x31] ss:$2 sm:$0xff] }
  0x41   : > { %v723_v25 = vpack.c.bf16 %v708_v23, %v708_v23  ;;  %v712_v27 = vld [vmem:[#allocation2 + $0x90] ss:$2 sm:$0xff]  ;;  %v724_v32 = vpack.c.bf16 %v710_v30, %v710_v30  ;;  %v747_v33 = vpack.c.bf16 %v732_v31, %v732_v31  ;;  %v714_v34 = vld [vmem:[#allocation2 + $0xc0] ss:$2 sm:$0xff]  ;;  %v736_v35 = vld [vmem:[#allocation2 + $0x91] ss:$2 sm:$0xff] }
  0x42   : > { %813 = vrot.lane.b32.xlu1 %v629_v63, %s2758_s26  ;;  %v725_v29 = vpack.c.bf16 %v712_v27, %v712_v27  ;;  %v726_v37 = vpack.c.bf16 %v714_v34, %v714_v34  ;;  %v749_v38 = vpack.c.bf16 %v736_v35, %v736_v35  ;;  %v734_v39 = vld [vmem:[#allocation2 + $0x61] ss:$2 sm:$0xff]  ;;  %v756_v40 = vld [vmem:[#allocation2 + $0x32] ss:$2 sm:$0xff]  ;;  %v758_v49 = vld [vmem:[#allocation2 + $0x62] ss:$2 sm:$0xff] }
  0x43   : > { %835 = vrot.lane.b32.xlu0 %v651_v1, %s3538_s28  ;;  %v2632_v41 = vld [vmem:[%s3549_s1 + $0x8] sm:$0xff]   ;;  %v748_v42 = vpack.c.bf16 %v734_v39, %v734_v39  ;;  %v771_v43 = vpack.c.bf16 %v756_v40, %v756_v40  ;;  %v2633_v46 = vld [vmem:[%s3549_s1 + $0x10] ss:$0 sps:$4 sm:$0x33]   ;;  %v760_v50 = vld [vmem:[#allocation2 + $0x92] ss:$2 sm:$0xff]  ;;  %v772_v52 = vpack.c.bf16 %v758_v49, %v758_v49 }
  0x44   : > { %v738_v44 = vld [vmem:[#allocation2 + $0xc1] ss:$2 sm:$0xff]  ;;  %2527 = vmatprep.subr.bf16.mxu1 %v2632_v41  ;;  %v1169_v51 = vsel %vm1167_vm3, %v2633_v46, 0  ;;  %v773_v53 = vpack.c.bf16 %v760_v50, %v760_v50  ;;  %v599_v54 = vld [vmem:[#allocation2 + $0xf1] ss:$2 sm:$0xff] }
  0x45   : > { %v597_v45 = vld [vmem:[#allocation2 + $0xc1] ss:$2 sm:$0xff]  ;;  %2528 = vmatpush3.bf16.msra.mxu1 %v2632_v41  ;;  %v750_v47 = vpack.c.bf16 %v738_v44, %v738_v44  ;;  %v609_v56 = vpack.c.bf16 %v599_v54, %v599_v54  ;;  %v762_v58 = vld [vmem:[#allocation2 + $0xc2] ss:$2 sm:$0xff]  ;;  %v603_v62 = vld [vmem:[#allocation2 + $0x151] ss:$2 sm:$0xff] }
  0x46   : > { %817 = vrot.lane.b32.xlu1 %v631_v4, %s2758_s26  ;;  %v608_v48 = vpack.c.bf16 %v597_v45, %v597_v45  ;;  %2570 = vmatprep.subr.msk.bf16.mxu1 %vm1167_vm3, %v2633_v46  ;;  %v601_v55 = vld [vmem:[#allocation2 + $0x121] ss:$2 sm:$0xff]  ;;  %v621_v59 = vld [vmem:[#allocation2 + $0xc2] ss:$2 sm:$0xff]  ;;  %v774_v60 = vpack.c.bf16 %v762_v58, %v762_v58  ;;  %v611_v1 = vpack.c.bf16 %v603_v62, %v603_v62  ;;  %v623_v3 = vld [vmem:[#allocation2 + $0xf2] ss:$2 sm:$0xff] }
  0x47   : > { %839 = vrot.lane.b32.xlu0 %v653_v5, %s3538_s28  ;;  %v610_v57 = vpack.c.bf16 %v601_v55, %v601_v55  ;;  %v632_v61 = vpack.c.bf16 %v621_v59, %v621_v59  ;;  %v625_v63 = vld [vmem:[#allocation2 + $0x122] ss:$2 sm:$0xff]  ;;  %v633_v5 = vpack.c.bf16 %v623_v3, %v623_v3  ;;  %v627_v7 = vld [vmem:[#allocation2 + $0x152] ss:$2 sm:$0xff]  ;;  %v672_v16 = vld [vmem:[#allocation2 + $0x139] ss:$2 sm:$0xff] }
  0x48   : > { %v634_v2 = vpack.c.bf16 %v625_v63, %v625_v63  ;;  %v644_v4 = vld [vmem:[#allocation2 + $0xd8] ss:$2 sm:$0xff]  ;;  %v646_v11 = vld [vmem:[#allocation2 + $0x108] ss:$2 sm:$0xff]  ;;  %v670_v19 = vld [vmem:[#allocation2 + $0x109] ss:$2 sm:$0xff] }
  0x49   : > { %2530 = vmatpush3.bf16.msra.mxu1 %v1169_v51  ;;  %v655_v6 = vpack.c.bf16 %v644_v4, %v644_v4  ;;  %v650_v15 = vld [vmem:[#allocation2 + $0x168] ss:$2 sm:$0xff]  ;;  %v674_v23 = vld [vmem:[#allocation2 + $0x169] ss:$2 sm:$0xff]  ;;  %1362 = vst.msk [vmem:[#allocation3 + $0x38] sm:$0x3] %vm1355_vm11, %v2756_v0 }
  0x4a   : > { %837 = vrot.lane.b32.xlu1 %v652_v8, %s3538_s28  ;;  %2539 = vmatprep.subr.bf16.mxu1 %v2756_v0  ;;  %v648_v8 = vld [vmem:[#allocation2 + $0x138] ss:$2 sm:$0xff]  ;;  %v740_v36 = vld [vmem:[#allocation2 + $0xf1] ss:$2 sm:$0xff]  ;;  %v742_v44 = vld [vmem:[#allocation2 + $0x121] ss:$2 sm:$0xff] }
  0x4b   : > { %859 = vrot.lane.b32.xlu0 %v675_v9, %s3536_s29  ;;  %v635_v9 = vpack.c.bf16 %v627_v7, %v627_v7  ;;  %v657_v10 = vpack.c.bf16 %v648_v8, %v648_v8  ;;  %v694_v27 = vld [vmem:[#allocation2 + $0x10a] ss:$2 sm:$0xff]  ;;  %v744_v40 = vld [vmem:[#allocation2 + $0x151] ss:$2 sm:$0xff]  ;;  %v752_v46 = vpack.c.bf16 %v742_v44, %v742_v44  ;;  %v746_v49 = vld [vmem:[#allocation2 + $0x181] ss:$2 sm:$0xff] }
  0x4c   : > { %v698_v31 = vld [vmem:[#allocation2 + $0x16a] ss:$2 sm:$0xff]  ;;  %v754_v51 = vpack.c.bf16 %v746_v49, %v746_v49  ;;  %1356 = vst.msk [vmem:[#allocation3 + $0x8] sm:$0x3] %vm1355_vm11, %v2756_v0  ;;  %1358 = vst.msk [vmem:[#allocation3 + $0x18] sm:$0x3] %vm1355_vm11, %v2756_v0 }
  0x4d   : > { %v718_v35 = vld [vmem:[#allocation2 + $0x120] ss:$2 sm:$0xff]  ;;  %1360 = vst.msk [vmem:[#allocation3 + $0x28] sm:$0x3] %vm1355_vm11, %v2756_v0  ;;  %1364 = vst.msk [vmem:[#allocation3 + $0x48] sm:$0x3] %vm1355_vm11, %v2756_v0 }
  0x4e   : > { %841 = vrot.lane.b32.xlu1 %v654_v12, %s3538_s28  ;;  %s3542_s28 = smov 32   ;;  %v668_v12 = vld [vmem:[#allocation2 + $0xd9] ss:$2 sm:$0xff]  ;;  %v722_v39 = vld [vmem:[#allocation2 + $0x180] ss:$2 sm:$0xff] }
  0x4f   : > { %863 = vrot.lane.b32.xlu0 %v677_v13, %s3536_s29  ;;  %v656_v13 = vpack.c.bf16 %v646_v11, %v646_v11  ;;  %v679_v14 = vpack.c.bf16 %v668_v12, %v668_v12  ;;  %v730_v41 = vpack.c.bf16 %v722_v39, %v722_v39  ;;  %v764_v45 = vld [vmem:[#allocation2 + $0xf2] ss:$2 sm:$0xff]  ;;  %1366 = vst.msk [vmem:[#allocation3 + $0x58] sm:$0x3] %vm1355_vm11, %v2756_v0  ;;  %1368 = vst.msk [vmem:[#allocation3 + $0x68] sm:$0x3] %vm1355_vm11, %v2756_v0 }
  0x50   : > { %v768_v50 = vld [vmem:[#allocation2 + $0x152] ss:$2 sm:$0xff]  ;;  %1370 = vst.msk [vmem:[#allocation3 + $0x78] sm:$0x3] %vm1355_vm11, %v2756_v0  ;;  %1372 = vst.msk [vmem:[#allocation3 + $0x88] sm:$0x3] %vm1355_vm11, %v2756_v0 }
  0x51   : > { %vm1631_vm11 = vcmask 392192  }
  0x52   : > { %861 = vrot.lane.b32.xlu1 %v676_v17, %s3536_s29  ;;  %v658_v17 = vpack.c.bf16 %v650_v15, %v650_v15 }
  0x53   : > { %883 = vrot.lane.b32.xlu0 %v699_v18, %s3534_s15  ;;  %v681_v18 = vpack.c.bf16 %v672_v16, %v672_v16  ;;  %v565_v16 = vld [vmem:[#allocation2] ss:$2 sm:$0xff] }
  0x56   : > { %865 = vrot.lane.b32.xlu1 %v678_v20, %s3536_s29  ;;  %s3550_s29 = smov 12   ;;  %v692_v20 = vld [vmem:[#allocation2 + $0xda] ss:$2 sm:$0xff] }
  0x57   : > { %887 = vrot.lane.b32.xlu0 %v701_v21, %s3534_s15  ;;  %v680_v21 = vpack.c.bf16 %v670_v19, %v670_v19  ;;  %v703_v22 = vpack.c.bf16 %v692_v20, %v692_v20 }
  0x5a   : > { %885 = vrot.lane.b32.xlu1 %v700_v24, %s3534_s15  ;;  %v696_v24 = vld [vmem:[#allocation2 + $0x13a] ss:$2 sm:$0xff] }
  0x5b   : > { %907 = vrot.lane.b32.xlu0 %v723_v25, %s2762_s16  ;;  %v682_v25 = vpack.c.bf16 %v674_v23, %v674_v23  ;;  %v705_v26 = vpack.c.bf16 %v696_v24, %v696_v24 }
  0x5e   : > { %889 = vrot.lane.b32.xlu1 %v702_v28, %s3534_s15  ;;  %s3552_s15 = smov 20   ;;  %v716_v28 = vld [vmem:[#allocation2 + $0xf0] ss:$2 sm:$0xff] }
  0x5f   : > { %911 = vrot.lane.b32.xlu0 %v725_v29, %s2762_s16  ;;  %v704_v29 = vpack.c.bf16 %v694_v27, %v694_v27  ;;  %v727_v30 = vpack.c.bf16 %v716_v28, %v716_v28  ;;  %v571_v28 = vld [vmem:[#allocation2 + $0x90] ss:$2 sm:$0xff] }
  0x62   : > { %909 = vrot.lane.b32.xlu1 %v724_v32, %s2762_s16  ;;  %v720_v32 = vld [vmem:[#allocation2 + $0x150] ss:$2 sm:$0xff] }
  0x63   : > { %931 = vrot.lane.b32.xlu0 %v747_v33, %s2763_s19  ;;  %v706_v33 = vpack.c.bf16 %v698_v31, %v698_v31  ;;  %v729_v34 = vpack.c.bf16 %v720_v32, %v720_v32 }
  0x66   : > { %913 = vrot.lane.b32.xlu1 %v726_v37, %s2762_s16  ;;  %v728_v37 = vpack.c.bf16 %v718_v35, %v718_v35 }
  0x67   : > { %935 = vrot.lane.b32.xlu0 %v749_v38, %s2763_s19  ;;  %v751_v38 = vpack.c.bf16 %v740_v36, %v740_v36 }
  0x6a   : > { %933 = vrot.lane.b32.xlu1 %v748_v42, %s2763_s19  ;;  %v753_v42 = vpack.c.bf16 %v744_v40, %v744_v40 }
  0x6b   : > { %955 = vrot.lane.b32.xlu0 %v771_v43, %s3542_s28 }
  0x6e   : > { %937 = vrot.lane.b32.xlu1 %v750_v47, %s2763_s19  ;;  %v775_v47 = vpack.c.bf16 %v764_v45, %v764_v45 }
  0x6f   : > { %795 = vrot.lane.b32.xlu0 %v608_v48, %s2757_s20 }
  0x72   : > { %957 = vrot.lane.b32.xlu1 %v772_v52, %s3542_s28  ;;  %v777_v52 = vpack.c.bf16 %v768_v50, %v768_v50 }
  0x73   : > { %959 = vrot.lane.b32.xlu0 %v773_v53, %s3542_s28  ;;  %v766_v53 = vld [vmem:[#allocation2 + $0x122] ss:$2 sm:$0xff] }
  0x76   : > { %797 = vrot.lane.b32.xlu1 %v609_v56, %s2757_s20  ;;  %v776_v56 = vpack.c.bf16 %v766_v53, %v766_v53 }
  0x77   : > { %799 = vrot.lane.b32.xlu0 %v610_v57, %s2757_s20  ;;  %v770_v57 = vld [vmem:[#allocation2 + $0x182] ss:$2 sm:$0xff] }
  0x7a   : > { %961 = vrot.lane.b32.xlu1 %v774_v60, %s3542_s28  ;;  %v778_v60 = vpack.c.bf16 %v770_v57, %v770_v57 }
  0x7b   : > { %819 = vrot.lane.b32.xlu0 %v632_v61, %s2758_s26 }
  0x7e   : > { %801 = vrot.lane.b32.xlu1 %v611_v1, %s2757_s20  ;;  %s3551_s20 = smov 16  }
  0x7f   : > { %823 = vrot.lane.b32.xlu0 %v634_v2, %s2758_s26 }
  0x82   : > { %821 = vrot.lane.b32.xlu1 %v633_v5, %s2758_s26 }
  0x83   : > { %843 = vrot.lane.b32.xlu0 %v655_v6, %s3550_s29 }
  0x86   : > { %825 = vrot.lane.b32.xlu1 %v635_v9, %s2758_s26 }
  0x87   : > { %847 = vrot.lane.b32.xlu0 %v657_v10, %s3550_s29 }
  0x8a   : > { %845 = vrot.lane.b32.xlu1 %v656_v13, %s3550_s29 }
  0x8b   : > { %867 = vrot.lane.b32.xlu0 %v679_v14, %s3551_s20 }
  0x8d   : > { %v788_v43 = vpop.permute.xlu0 %787 }
  0x8e   : > { %849 = vrot.lane.b32.xlu1 %v658_v17, %s3550_s29  ;;  %v567_v17 = vld [vmem:[#allocation2 + $0x30] ss:$2 sm:$0xff]  ;;  %s404_s29 = sand.u32 1, %s2746_s22  }
  0x8f   : > { %871 = vrot.lane.b32.xlu0 %v681_v18, %s3551_s20  ;;  %v580_v18 = vpack.c.bf16 %v565_v16, %v565_v16  ;;  %v581_v19 = vpack.c.bf16 %v567_v17, %v567_v17 }
  0x92   : > { %869 = vrot.lane.b32.xlu1 %v680_v21, %s3551_s20 }
  0x93   : > { %891 = vrot.lane.b32.xlu0 %v703_v22, %s3552_s15  ;;  %v973_v22 = vsel %vm412_vm0, %v580_v18, %v788_v43 }
  0x96   : > { %873 = vrot.lane.b32.xlu1 %v682_v25, %s3551_s20 }
  0x97   : > { %895 = vrot.lane.b32.xlu0 %v705_v26, %s3552_s15  ;;  %v569_v26 = vld [vmem:[#allocation2 + $0x60] ss:$2 sm:$0xff] }
  0x9a   : > { %893 = vrot.lane.b32.xlu1 %v704_v29, %s3552_s15 }
  0x9b   : > { %915 = vrot.lane.b32.xlu0 %v727_v30, %s2762_s16 }
  0x9e   : > { %897 = vrot.lane.b32.xlu1 %v706_v33, %s3552_s15  ;;  %v812_v48 = vpop.permute.xlu0 %811  ;;  %s2765_s15 = smov 40  }
  0x9f   : > { %919 = vrot.lane.b32.xlu0 %v729_v34, %s2762_s16  ;;  %v997_v27 = vsel %vm995_vm2, %v973_v22, %v812_v48  ;;  %v582_v34 = vpack.c.bf16 %v569_v26, %v569_v26 }
  0xa2   : > { %917 = vrot.lane.b32.xlu1 %v728_v37, %s2762_s16  ;;  %v583_v37 = vpack.c.bf16 %v571_v28, %v571_v28  ;;  %v575_v28 = vld [vmem:[#allocation2 + $0xf0] ss:$2 sm:$0xff] }
  0xa3   : > { %939 = vrot.lane.b32.xlu0 %v751_v38, %s2763_s19 }
  0xa6   : > { %921 = vrot.lane.b32.xlu1 %v730_v41, %s2762_s16 }
  0xa7   : > { %943 = vrot.lane.b32.xlu0 %v753_v42, %s2763_s19 }
  0xaa   : > { %941 = vrot.lane.b32.xlu1 %v752_v46, %s2763_s19 }
  0xab   : > { %963 = vrot.lane.b32.xlu0 %v775_v47, %s3542_s28 }
  0xac   : > { %v3140_v54 = vpop.permute.xlu1 %791 }
  0xad   : > { %v790_v55 = vpop.permute.xlu0 %789  ;;  %v979_v48 = vsel %vm412_vm0, %v582_v34, %v3140_v54 }
  0xae   : > { %945 = vrot.lane.b32.xlu1 %v754_v51, %s2763_s19  ;;  %v976_v23 = vsel %vm412_vm0, %v581_v19, %v790_v55  ;;  %s2766_s19 = smov 48  }
  0xaf   : > { %967 = vrot.lane.b32.xlu0 %v777_v52, %s3542_s28 }
  0xb0   : > { %v3144_v58 = vpop.permute.xlu1 %793 }
  0xb1   : > { %v3146_v59 = vpop.permute.xlu0 %815  ;;  %v982_v49 = vsel %vm412_vm0, %v583_v37, %v3144_v58 }
  0xb2   : > { %965 = vrot.lane.b32.xlu1 %v776_v56, %s3542_s28  ;;  %v1001_v51 = vsel %vm995_vm2, %v979_v48, %v3146_v59 }
  0xb4   : > { %v814_v61 = vpop.permute.xlu1 %813 }
  0xb5   : > { %v836_v62 = vpop.permute.xlu0 %835  ;;  %v999_v29 = vsel %vm995_vm2, %v976_v23, %v814_v61 }
  0xb6   : > { %969 = vrot.lane.b32.xlu1 %v778_v60, %s3542_s28  ;;  %v1014_v30 = vsel %vm1012_vm4, %v997_v27, %v836_v62  ;;  %v573_v27 = vld [vmem:[#allocation2 + $0xc0] ss:$2 sm:$0xff] }
  0xb8   : > { %v818_v63 = vpop.permute.xlu1 %817 }
  0xb9   : > { %v840_v1 = vpop.permute.xlu0 %839  ;;  %v1003_v52 = vsel %vm995_vm2, %v982_v49, %v818_v63 }
  0xba   : > { %v1018_v53 = vsel %vm1012_vm4, %v1001_v51, %v840_v1 }
  0xbc   : > { %v838_v2 = vpop.permute.xlu1 %837 }
  0xbd   : > { %v860_v3 = vpop.permute.xlu0 %859  ;;  %v1016_v31 = vsel %vm1012_vm4, %v999_v29, %v838_v2 }
  0xbe   : > { %v1031_v35 = vsel %vm1029_vm5, %v1014_v30, %v860_v3  ;;  %v577_v30 = vld [vmem:[#allocation2 + $0x120] ss:$2 sm:$0xff] }
  0xc0   : > { %v842_v4 = vpop.permute.xlu1 %841 }
  0xc1   : > { %v864_v5 = vpop.permute.xlu0 %863  ;;  %v1020_v55 = vsel %vm1012_vm4, %v1003_v52, %v842_v4 }
  0xc2   : > { %v1035_v60 = vsel %vm1029_vm5, %v1018_v53, %v864_v5 }
  0xc4   : > { %v862_v6 = vpop.permute.xlu1 %861 }
  0xc5   : > { %v884_v7 = vpop.permute.xlu0 %883  ;;  %v1033_v36 = vsel %vm1029_vm5, %v1016_v31, %v862_v6  ;;  %v584_v31 = vpack.c.bf16 %v573_v27, %v573_v27 }
  0xc6   : > { %v1048_v38 = vsel %vm1046_vm6, %v1031_v35, %v884_v7  ;;  %v579_v35 = vld [vmem:[#allocation2 + $0x150] ss:$2 sm:$0xff] }
  0xc8   : > { %v866_v8 = vpop.permute.xlu1 %865 }
  0xc9   : > { %v888_v9 = vpop.permute.xlu0 %887  ;;  %v1037_v54 = vsel %vm1029_vm5, %v1020_v55, %v866_v8 }
  0xca   : > { %v1052_v58 = vsel %vm1046_vm6, %v1035_v60, %v888_v9 }
  0xcc   : > { %v886_v10 = vpop.permute.xlu1 %885 }
  0xcd   : > { %v908_v11 = vpop.permute.xlu0 %907  ;;  %v1050_v39 = vsel %vm1046_vm6, %v1033_v36, %v886_v10  ;;  %v586_v36 = vpack.c.bf16 %v577_v30, %v577_v30 }
  0xce   : > { %v1065_v40 = vsel %vm1063_vm7, %v1048_v38, %v908_v11 }
  0xd0   : > { %v890_v12 = vpop.permute.xlu1 %889 }
  0xd1   : > { %v912_v13 = vpop.permute.xlu0 %911  ;;  %v1054_v61 = vsel %vm1046_vm6, %v1037_v54, %v890_v12 }
  0xd2   : > { %v1069_v59 = vsel %vm1063_vm7, %v1052_v58, %v912_v13 }
  0xd4   : > { %v910_v14 = vpop.permute.xlu1 %909 }
  0xd5   : > { %v932_v15 = vpop.permute.xlu0 %931  ;;  %v1067_v41 = vsel %vm1063_vm7, %v1050_v39, %v910_v14 }
  0xd6   : > { %v1082_v42 = vsel %vm1080_vm8, %v1065_v40, %v932_v15  ;;  %v587_v40 = vpack.c.bf16 %v579_v35, %v579_v35 }
  0xd8   : > { %v914_v20 = vpop.permute.xlu1 %913 }
  0xd9   : > { %v936_v21 = vpop.permute.xlu0 %935  ;;  %v1071_v62 = vsel %vm1063_vm7, %v1054_v61, %v914_v20 }
  0xda   : > { %v1086_v63 = vsel %vm1080_vm8, %v1069_v59, %v936_v21 }
  0xdc   : > { %v934_v24 = vpop.permute.xlu1 %933 }
  0xdd   : > { %v956_v25 = vpop.permute.xlu0 %955  ;;  %v1084_v43 = vsel %vm1080_vm8, %v1067_v41, %v934_v24 }
  0xde   : > { %v1099_v46 = vsel %vm1097_vm9, %v1082_v42, %v956_v25 }
  0xe0   : > { %v938_v32 = vpop.permute.xlu1 %937 }
  0xe1   : > { %v3156_v33 = vpop.permute.xlu0 %795  ;;  %v1088_v1 = vsel %vm1080_vm8, %v1071_v62, %v938_v32  ;;  %v585_v32 = vpack.c.bf16 %v575_v28, %v575_v28 }
  0xe2   : > { %v985_v38 = vsel %vm412_vm0, %v584_v31, %v3156_v33 }
  0xe4   : > { %v958_v44 = vpop.permute.xlu1 %957 }
  0xe5   : > { %v960_v45 = vpop.permute.xlu0 %959  ;;  %v1101_v47 = vsel %vm1097_vm9, %v1084_v43, %v958_v44 }
  0xe6   : > { %v2390_v50 = vcombine.low %v1099_v46, %v1101_v47  ;;  %v1103_v4 = vsel %vm1097_vm9, %v1086_v63, %v960_v45 }
  0xe8   : > { %v798_v56 = vpop.permute.xlu1 %797  ;;  %2531 = vmatprep.mubr.msk.bf16.mxu1 %vm1154_vm10, %v2390_v50 }
  0xe9   : > { %v800_v57 = vpop.permute.xlu0 %799  ;;  %v988_v39 = vsel %vm412_vm0, %v585_v32, %v798_v56 }
  0xea   : > { %v991_v43 = vsel %vm412_vm0, %v586_v36, %v800_v57 }
  0xec   : > { %v962_v2 = vpop.permute.xlu1 %961 }
  0xed   : > { %v820_v3 = vpop.permute.xlu0 %819  ;;  %v1105_v5 = vsel %vm1097_vm9, %v1088_v1, %v962_v2 }
  0xee   : > { %v2391_v6 = vcombine.low %v1103_v4, %v1105_v5  ;;  %v1005_v41 = vsel %vm995_vm2, %v985_v38, %v820_v3 }
  0xf0   : > { %v802_v7 = vpop.permute.xlu1 %801  ;;  %2532 = vmatmul.mubr.msk.bf16.vlgmr.msra.gmra.mrb[0].mxu1 %vm1154_vm10, %v2391_v6 }
  0xf1   : > { %v824_v8 = vpop.permute.xlu0 %823  ;;  %v994_v33 = vsel %vm412_vm0, %v587_v40, %v802_v7 }
  0xf2   : > { %v1009_v52 = vsel %vm995_vm2, %v991_v43, %v824_v8 }
  0xf4   : > { %v822_v9 = vpop.permute.xlu1 %821 }
  0xf5   : > { %v844_v10 = vpop.permute.xlu0 %843  ;;  %v1007_v42 = vsel %vm995_vm2, %v988_v39, %v822_v9 }
  0xf6   : > { %v1022_v44 = vsel %vm1012_vm4, %v1005_v41, %v844_v10 }
  0xf8   : > { %v826_v11 = vpop.permute.xlu1 %825 }
  0xf9   : > { %v848_v12 = vpop.permute.xlu0 %847  ;;  %v1011_v53 = vsel %vm995_vm2, %v994_v33, %v826_v11 }
  0xfa   : > { %v1026_v57 = vsel %vm1012_vm4, %v1009_v52, %v848_v12 }
  0xfc   : > { %v846_v13 = vpop.permute.xlu1 %845 }
  0xfd   : > { %v868_v14 = vpop.permute.xlu0 %867  ;;  %v1024_v45 = vsel %vm1012_vm4, %v1007_v42, %v846_v13 }
  0xfe   : > { %v1039_v48 = vsel %vm1029_vm5, %v1022_v44, %v868_v14  ;;  %v1396_v14 = vld [vmem:[#allocation3 + $0x1] ss:$2 sm:$0xf] }
 0x100   : > { %v850_v15 = vpop.permute.xlu1 %849 }
 0x101   : > { %v872_v16 = vpop.permute.xlu0 %871  ;;  %v1028_v60 = vsel %vm1012_vm4, %v1011_v53, %v850_v15  ;;  %v1403_v15 = vpack.c.bf16 %v1396_v14, %v1396_v14 }
 0x102   : > { %v1043_v59 = vsel %vm1029_vm5, %v1026_v57, %v872_v16  ;;  %v1408_v16 = vld [vmem:[#allocation3 + $0x2] ss:$2 sm:$0xf] }
 0x103   : > { %1494 = vrot.lane.b32.xlu0 %v1403_v15, %s2758_s26 }
 0x104   : > { %v870_v17 = vpop.permute.xlu1 %869 }
 0x105   : > { %v892_v18 = vpop.permute.xlu0 %891  ;;  %v1041_v49 = vsel %vm1029_vm5, %v1024_v45, %v870_v17  ;;  %v1415_v17 = vpack.c.bf16 %v1408_v16, %v1408_v16 }
 0x106   : > { %v1056_v50 = vsel %vm1046_vm6, %v1039_v48, %v892_v18  ;;  %v3238_v18 = vld [vmem:[%s3523_s2] ss:$0 sm:$0xff] }
 0x107   : > { %1506 = vrot.lane.b32.xlu0 %v1415_v17, %s3551_s20 }
 0x108   : > { %v874_v19 = vpop.permute.xlu1 %873 }
 0x109   : > { %v896_v20 = vpop.permute.xlu0 %895  ;;  %v1045_v62 = vsel %vm1029_vm5, %v1028_v60, %v874_v19 }
 0x10a   : > { %v1060_v2 = vsel %vm1046_vm6, %v1043_v59, %v896_v20  ;;  %v3243_v20 = vld [vmem:[%s3524_s3] ss:$0 sm:$0xff] }
 0x10c   : > { %v894_v21 = vpop.permute.xlu1 %893 }
 0x10d   : > { %v916_v22 = vpop.permute.xlu0 %915  ;;  %v1058_v51 = vsel %vm1046_vm6, %v1041_v49, %v894_v21 }
 0x10e   : > { %v1073_v55 = vsel %vm1063_vm7, %v1056_v50, %v916_v22 }
 0x110   : > { %v898_v23 = vpop.permute.xlu1 %897 }
 0x111   : > { %v920_v24 = vpop.permute.xlu0 %919  ;;  %v1062_v3 = vsel %vm1046_vm6, %v1045_v62, %v898_v23  ;;  %vm1719_vm6 = vcmask 1043456  }
 0x112   : > { %v1077_v6 = vsel %vm1063_vm7, %v1060_v2, %v920_v24 }
 0x114   : > { %v918_v25 = vpop.permute.xlu1 %917 }
 0x115   : > { %v940_v26 = vpop.permute.xlu0 %939  ;;  %v1075_v56 = vsel %vm1063_vm7, %v1058_v51, %v918_v25 }
 0x116   : > { %v1090_v54 = vsel %vm1080_vm8, %v1073_v55, %v940_v26 }
 0x118   : > { %v922_v29 = vpop.permute.xlu1 %921 }
 0x119   : > { %v944_v34 = vpop.permute.xlu0 %943  ;;  %v1079_v7 = vsel %vm1063_vm7, %v1062_v3, %v922_v29 }
 0x11a   : > { %v1094_v8 = vsel %vm1080_vm8, %v1077_v6, %v944_v34 }
 0x11c   : > { %v942_v37 = vpop.permute.xlu1 %941 }
 0x11d   : > { %v964_v46 = vpop.permute.xlu0 %963  ;;  %v1092_v58 = vsel %vm1080_vm8, %v1075_v56, %v942_v37 }
 0x11e   : > { %v1107_v63 = vsel %vm1097_vm9, %v1090_v54, %v964_v46 }
 0x120   : > { %v946_v47 = vpop.permute.xlu1 %945 }
 0x121   : > { %v968_v4 = vpop.permute.xlu0 %967  ;;  %v1096_v9 = vsel %vm1080_vm8, %v1079_v7, %v946_v47  ;;  %vm2769_vm8 = vmmov 0  }
 0x122   : > { %v1111_v11 = vsel %vm1097_vm9, %v1094_v8, %v968_v4 }
 0x124   : > { %v966_v61 = vpop.permute.xlu1 %965 }
 0x125   : > { %v1109_v1 = vsel %vm1097_vm9, %v1092_v58, %v966_v61 }
 0x126   : > { %v2392_v5 = vcombine.low %v1107_v63, %v1109_v1 }
 0x128   : > { %v970_v10 = vpop.permute.xlu1 %969  ;;  %2535 = vmatprep.mubr.msk.bf16.mxu1 %vm1154_vm10, %v2392_v5 }
 0x129   : > { %v1113_v12 = vsel %vm1097_vm9, %v1096_v9, %v970_v10 }
 0x12a   : > { %v2393_v13 = vcombine.low %v1111_v11, %v1113_v12 }
 0x12c   : > { %2536 = vmatmul.mubr.msk.bf16.gmra.mrb[4].mxu1 %vm1154_vm10, %v2393_v13  ;;  %vm1622_vm10 = vcmask 326656  }
 0x12d   : > { %2549 = vmatprep.mubr.msk.bf16.mxu1 %vm2769_vm8, %v2756_v0 }
 0x1c3   : > { %v2533_v19 = vpop.f32.mrb[0].mxu1 }
 0x1c4   : > { %v1245_v21 = vmul.f32 %v2533_v19, %v3238_v18  ;;  %v1205_v22 = vpop.f32.mrb[1].mxu1 }
 0x1c5   : > { %v1243_v23 = vmul.f32 %v3238_v18, %v1205_v22  ;;  %v2534_v24 = vpop.f32.mrb[2].mxu1 }
 0x1c6   : > { %v1260_v25 = vadd.f32 %v3243_v20, %v1245_v21  ;;  %v1246_v26 = vmul.f32 %v2534_v24, %v3238_v18  ;;  %v1208_v27 = vpop.f32.mrb[3].mxu1 }
 0x1c7   : > { %v1258_v28 = vadd.f32 %v3243_v20, %v1243_v23  ;;  %v1244_v29 = vmul.f32 %v3238_v18, %v1208_v27 }
 0x1c8   : > { %v1268_v30 = vmin.f32 %v1260_v25, 20.0  ;;  %v1261_v31 = vadd.f32 %v3243_v20, %v1246_v26  ;;  %vm1332_vm12 = vcmp.gt.f32.partialorder %v1260_v25, 20.0 }
 0x1c9   : > { %v1266_v32 = vmin.f32 %v1258_v28, 20.0  ;;  %v1259_v34 = vadd.f32 %v3243_v20, %v1244_v29  ;;  %vm1330_vm13 = vcmp.gt.f32.partialorder %v1258_v28, 20.0 }
 0x1ca   : > { %v1278_v35 = vmul.f32 1.442695, %v1268_v30  ;;  %v1269_v36 = vmin.f32 %v1261_v31, 20.0  ;;  %vm1333_vm14 = vcmp.gt.f32.partialorder %v1261_v31, 20.0 }
 0x1cb   : > { %v1274_v37 = vmul.f32 1.442695, %v1266_v32  ;;  %v1267_v38 = vmin.f32 %v1259_v34, 20.0  ;;  %vm1331_vm15 = vcmp.gt.f32.partialorder %v1259_v34, 20.0 }
 0x1cc   : > { %2648 = vpow2.f32 %v1278_v35  ;;  %v1280_v39 = vmul.f32 1.442695, %v1269_v36 }
 0x1cd   : > { %2650 = vpow2.f32 %v1274_v37  ;;  %v1276_v40 = vmul.f32 1.442695, %v1267_v38 }
 0x1ce   : > { %2652 = vpow2.f32 %v1280_v39 }
 0x1cf   : > { %2654 = vpow2.f32 %v1276_v40 }
 0x1d6   : > { %v2649_v41 = vpop.eup %2648 }
 0x1d7   : > { %v2651_v42 = vpop.eup %2650  ;;  %v1292_v43 = vadd.f32 2.0, %v2649_v41 }
 0x1d8   : > { %v2653_v44 = vpop.eup %2652  ;;  %v1290_v45 = vadd.f32 2.0, %v2651_v42 }
 0x1d9   : > { %v2655_v46 = vpop.eup %2654  ;;  %v1300_v47 = vmul.f32 %v2649_v41, %v1292_v43  ;;  %v1293_v48 = vadd.f32 2.0, %v2653_v44 }
 0x1da   : > { %v1298_v49 = vmul.f32 %v2651_v42, %v1290_v45  ;;  %v1291_v33 = vadd.f32 2.0, %v2655_v46 }
 0x1db   : > { %v1308_v50 = vadd.f32 2.0, %v1300_v47  ;;  %v1301_v51 = vmul.f32 %v2653_v44, %v1293_v48 }
 0x1dc   : > { %v1306_v52 = vadd.f32 2.0, %v1298_v49  ;;  %v1299_v53 = vmul.f32 %v2655_v46, %v1291_v33 }
 0x1dd   : > { %2656 = vrcp.f32 %v1308_v50  ;;  %v1309_v55 = vadd.f32 2.0, %v1301_v51 }
 0x1de   : > { %2658 = vrcp.f32 %v1306_v52  ;;  %v1307_v56 = vadd.f32 2.0, %v1299_v53 }
 0x1df   : > { %2660 = vrcp.f32 %v1309_v55 }
 0x1e0   : > { %2662 = vrcp.f32 %v1307_v56 }
 0x1e7   : > { %v2657_v57 = vpop.eup %2656 }
 0x1e8   : > { %v2659_v60 = vpop.eup %2658  ;;  %v1319_v54 = vmul.f32 %v2657_v57, %v1300_v47 }
 0x1e9   : > { %v2661_v58 = vpop.eup %2660  ;;  %v1315_v61 = vmul.f32 %v2659_v60, %v1298_v49 }
 0x1ea   : > { %v2663_v59 = vpop.eup %2662  ;;  %v1340_v62 = vmul.f32 %v1319_v54, %v1260_v25  ;;  %v1321_v63 = vmul.f32 %v2661_v58, %v1301_v51 }
 0x1eb   : > { %v1338_v1 = vmul.f32 %v1315_v61, %v1258_v28  ;;  %v1317_v2 = vmul.f32 %v2663_v59, %v1299_v53 }
 0x1ec   : > { %v1348_v3 = vsel %vm1332_vm12, %v1260_v25, %v1340_v62  ;;  %v1341_v4 = vmul.f32 %v1321_v63, %v1261_v31  ;;  %vm1640_vm12 = vcmask 457728  }
 0x1ed   : > { %1378 = vst.msk [vmem:[#allocation3 + $0x31] sm:$0xff] %vm995_vm2, %v1348_v3  ;;  %v1346_v5 = vsel %vm1330_vm13, %v1258_v28, %v1338_v1  ;;  %v1339_v6 = vmul.f32 %v1317_v2, %v1259_v34  ;;  %vm1649_vm13 = vcmask 523264  }
 0x1ee   : > { %1376 = vst.msk [vmem:[#allocation3 + $0x11] sm:$0xff] %vm995_vm2, %v1346_v5  ;;  %v1349_v7 = vsel %vm1333_vm14, %v1261_v31, %v1341_v4  ;;  %vm1818_vm14 = vcmask 125952  }
 0x1ef   : > { %1379 = vst.msk [vmem:[#allocation3 + $0x41] sm:$0xff] %vm995_vm2, %v1349_v7  ;;  %v1347_v8 = vsel %vm1331_vm15, %v1259_v34, %v1339_v6 }
 0x1f0   : > { %1377 = vst.msk [vmem:[#allocation3 + $0x21] sm:$0xff] %vm995_vm2, %v1347_v8 }
 0x1f4   : > { %v1421_v9 = vld [vmem:[#allocation3 + $0x30] ss:$2 sm:$0xf]  ;;  %v1433_v13 = vld [vmem:[#allocation3 + $0x31] ss:$2 sm:$0xf] }
 0x1f5   : > { %v1427_v10 = vpack.c.bf16 %v1421_v9, %v1421_v9  ;;  %v1419_v11 = vld [vmem:[#allocation3 + $0x10] ss:$2 sm:$0xf]  ;;  %v1431_v14 = vld [vmem:[#allocation3 + $0x11] ss:$2 sm:$0xf]  ;;  %v1439_v15 = vpack.c.bf16 %v1433_v13, %v1433_v13 }
 0x1f6   : > { %v1426_v12 = vpack.c.bf16 %v1419_v11, %v1419_v11  ;;  %v1438_v16 = vpack.c.bf16 %v1431_v14, %v1431_v14  ;;  %v1445_v17 = vld [vmem:[#allocation3 + $0x32] ss:$2 sm:$0xf]  ;;  %v1457_v23 = vld [vmem:[#allocation3 + $0x40] ss:$2 sm:$0xf] }
 0x1f7   : > { %1520 = vrot.lane.b32.xlu1 %v1427_v10, %s2762_s16  ;;  %v1443_v19 = vld [vmem:[#allocation3 + $0x12] ss:$2 sm:$0xf]  ;;  %v1451_v21 = vpack.c.bf16 %v1445_v17, %v1445_v17  ;;  %v1400_v25 = vld [vmem:[#allocation3 + $0x41] ss:$2 sm:$0xf]  ;;  %v1463_v30 = vpack.c.bf16 %v1457_v23, %v1457_v23 }
 0x1f8   : > { %1518 = vrot.lane.b32.xlu0 %v1426_v12, %s2762_s16  ;;  %v1450_v22 = vpack.c.bf16 %v1443_v19, %v1443_v19  ;;  %v1405_v35 = vpack.c.bf16 %v1400_v25, %v1400_v25  ;;  %v1469_v36 = vld [vmem:[#allocation3 + $0x41] ss:$2 sm:$0xf]  ;;  %v1412_v39 = vld [vmem:[#allocation3 + $0x42] ss:$2 sm:$0xf] }
 0x1f9   : > { %v1475_v44 = vpack.c.bf16 %v1469_v36, %v1469_v36  ;;  %v1417_v46 = vpack.c.bf16 %v1412_v39, %v1412_v39  ;;  %v1398_v47 = vld [vmem:[#allocation3 + $0x21] ss:$2 sm:$0xf]  ;;  %v1455_v33 = vld [vmem:[#allocation3 + $0x20] ss:$2 sm:$0xf] }
 0x1fa   : > { %v1404_v51 = vpack.c.bf16 %v1398_v47, %v1398_v47  ;;  %v1462_v52 = vpack.c.bf16 %v1455_v33, %v1455_v33  ;;  %v1410_v53 = vld [vmem:[#allocation3 + $0x22] ss:$2 sm:$0xf]  ;;  %v1467_v55 = vld [vmem:[#allocation3 + $0x21] ss:$2 sm:$0xf] }
 0x1fb   : > { %1532 = vrot.lane.b32.xlu1 %v1439_v15, %s3542_s28  ;;  %v1416_v56 = vpack.c.bf16 %v1410_v53, %v1410_v53  ;;  %v1474_v57 = vpack.c.bf16 %v1467_v55, %v1467_v55  ;;  %v1479_v60 = vld [vmem:[#allocation3 + $0x22] ss:$2 sm:$0xf] }
 0x1fc   : > { %1530 = vrot.lane.b32.xlu0 %v1438_v16, %s3542_s28  ;;  %v1486_v58 = vpack.c.bf16 %v1479_v60, %v1479_v60  ;;  %v2636_v53 = vld [vmem:[%s3525_s4 + $0x10] sm:$0xff]  }
 0x1fd   : > { %v1481_v60 = vld [vmem:[#allocation3 + $0x42] ss:$2 sm:$0xf] }
 0x1ff   : > { %1544 = vrot.lane.b32.xlu1 %v1451_v21, %s2765_s15  ;;  %v2537_v24 = vpop.f32.mrb[4].mxu1 }
 0x200   : > { %v1249_v26 = vmul.f32 %v2537_v24, %v3238_v18  ;;  %1542 = vrot.lane.b32.xlu0 %v1450_v22, %s2765_s15  ;;  %v1221_v27 = vpop.f32.mrb[5].mxu1 }
 0x201   : > { %v1247_v28 = vmul.f32 %v3238_v18, %v1221_v27  ;;  %v2538_v29 = vpop.f32.mrb[6].mxu1 }
 0x202   : > { %v3266_v31 = vadd.f32 %v3243_v20, %v1249_v26  ;;  %v1250_v32 = vmul.f32 %v2538_v29, %v3238_v18  ;;  %v1224_v34 = vpop.f32.mrb[7].mxu1 }
 0x203   : > { %v3270_v37 = vadd.f32 %v3243_v20, %v1247_v28  ;;  %v1248_v38 = vmul.f32 %v3238_v18, %v1224_v34  ;;  %1556 = vrot.lane.b32.xlu1 %v1463_v30, %s2766_s19 }
 0x204   : > { %v1272_v40 = vmin.f32 %v3266_v31, 20.0  ;;  %v3276_v41 = vadd.f32 %v3243_v20, %v1250_v32  ;;  %1498 = vrot.lane.b32.xlu0 %v1405_v35, %s2758_s26  ;;  %vm1336_vm0 = vcmp.gt.f32.partialorder %v3266_v31, 20.0 }
 0x205   : > { %v1270_v42 = vmin.f32 %v3270_v37, 20.0  ;;  %v3281_v43 = vadd.f32 %v3243_v20, %v1248_v38  ;;  %vm1334_vm1 = vcmp.gt.f32.partialorder %v3270_v37, 20.0 }
 0x206   : > { %v1286_v45 = vmul.f32 1.442695, %v1272_v40  ;;  %v1273_v18 = vmin.f32 %v3276_v41, 20.0  ;;  %vm1337_vm3 = vcmp.gt.f32.partialorder %v3276_v41, 20.0 }
 0x207   : > { %v1282_v48 = vmul.f32 1.442695, %v1270_v42  ;;  %v1271_v49 = vmin.f32 %v3281_v43, 20.0  ;;  %1568 = vrot.lane.b32.xlu1 %v1475_v44, %s2767_s17  ;;  %vm1335_vm4 = vcmp.gt.f32.partialorder %v3281_v43, 20.0  ;;  %v2634_v44 = vld [vmem:[%s3525_s4] sm:$0xff]  }
 0x208   : > { %2664 = vpow2.f32 %v1286_v45  ;;  %v1288_v50 = vmul.f32 1.442695, %v1273_v18  ;;  %1510 = vrot.lane.b32.xlu0 %v1417_v46, %s3551_s20  ;;  %2540 = vmatpush3.bf16.msra.mxu1 %v2634_v44  ;;  %v1676_v44 = vlaneseq }
 0x209   : > { %2666 = vpow2.f32 %v1282_v48  ;;  %v1284_v20 = vmul.f32 1.442695, %v1271_v49  ;;  %2541 = vmatprep.subr.bf16.mxu1 %v2756_v0  ;;  %v2635_v49 = vld [vmem:[%s3525_s4 + $0x8] sm:$0xff]  }
 0x20a   : > { %2668 = vpow2.f32 %v1288_v50 }
 0x20b   : > { %2670 = vpow2.f32 %v1284_v20  ;;  %1496 = vrot.lane.b32.xlu1 %v1404_v51, %s2758_s26 }
 0x20c   : > { %1554 = vrot.lane.b32.xlu0 %v1462_v52, %s2766_s19  ;;  %2542 = vmatpush3.bf16.msra.mxu1 %v2635_v49 }
 0x20d   : > { %2543 = vmatprep.subr.bf16.mxu1 %v2756_v0 }
 0x20f   : > { %1508 = vrot.lane.b32.xlu1 %v1416_v56, %s3551_s20 }
 0x210   : > { %1566 = vrot.lane.b32.xlu0 %v1474_v57, %s2767_s17  ;;  %2544 = vmatpush3.bf16.msra.mxu1 %v2636_v53 }
 0x211   : > { %2545 = vmatprep.subr.bf16.mxu1 %v2756_v0 }
 0x212   : > { %v2665_v54 = vpop.eup %2664 }
 0x213   : > { %v2667_v61 = vpop.eup %2666  ;;  %v1296_v59 = vadd.f32 2.0, %v2665_v54 }
 0x214   : > { %v2669_v62 = vpop.eup %2668  ;;  %v1294_v63 = vadd.f32 2.0, %v2667_v61  ;;  %1578 = vrot.lane.b32.xlu0 %v1486_v58, %s3540_s18  ;;  %v2638_v58 = vld [vmem:[%s3525_s4 + $0x20] ss:$0 sps:$4 sm:$0xff]   ;;  %s2772_s18 = smov 80  }
 0x215   : > { %v2671_v1 = vpop.eup %2670  ;;  %v1304_v2 = vmul.f32 %v2665_v54, %v1296_v59  ;;  %v1297_v3 = vadd.f32 2.0, %v2669_v62  ;;  %v2637_v54 = vld [vmem:[%s3525_s4 + $0x18] sm:$0xff]   ;;  %v1721_v59 = vsel %vm1719_vm6, %v2638_v58, 0 }
 0x216   : > { %v1302_v4 = vmul.f32 %v2667_v61, %v1294_v63  ;;  %v1295_v5 = vadd.f32 2.0, %v2671_v1  ;;  %2546 = vmatpush3.bf16.msra.mxu1 %v2637_v54  ;;  %v1487_v61 = vpack.c.bf16 %v1481_v60, %v1481_v60 }
 0x217   : > { %v1312_v6 = vadd.f32 2.0, %v1304_v2  ;;  %v1305_v7 = vmul.f32 %v2669_v62, %v1297_v3  ;;  %2547 = vmatprep.subr.bf16.mxu1 %v2756_v0 }
 0x218   : > { %v1310_v8 = vadd.f32 2.0, %v1302_v4  ;;  %v1303_v9 = vmul.f32 %v2671_v1, %v1295_v5  ;;  %v1495_v1 = vpop.permute.xlu0 %1494 }
 0x219   : > { %2672 = vrcp.f32 %v1312_v6  ;;  %v1313_v10 = vadd.f32 2.0, %v1305_v7 }
 0x21a   : > { %2674 = vrcp.f32 %v1310_v8  ;;  %v1311_v11 = vadd.f32 2.0, %v1303_v9  ;;  %2548 = vmatpush3.bf16.msra.mxu1 %v1721_v59 }
 0x21b   : > { %2676 = vrcp.f32 %v1313_v10 }
 0x21c   : > { %2678 = vrcp.f32 %v1311_v11 }
 0x223   : > { %v2673_v12 = vpop.eup %2672 }
 0x224   : > { %v2675_v13 = vpop.eup %2674  ;;  %v1327_v14 = vmul.f32 %v2673_v12, %v1304_v2  ;;  %v1507_v2 = vpop.permute.xlu0 %1506 }
 0x225   : > { %v2677_v15 = vpop.eup %2676  ;;  %v1323_v16 = vmul.f32 %v2675_v13, %v1302_v4 }
 0x226   : > { %v2679_v17 = vpop.eup %2678  ;;  %v1344_v19 = vmul.f32 %v1327_v14, %v3266_v31  ;;  %v1329_v21 = vmul.f32 %v2677_v15, %v1305_v7 }
 0x227   : > { %v1342_v22 = vmul.f32 %v1323_v16, %v3270_v37  ;;  %v1325_v23 = vmul.f32 %v2679_v17, %v1303_v9 }
 0x228   : > { %v1352_v24 = vsel %vm1336_vm0, %v3266_v31, %v1344_v19  ;;  %v1345_v25 = vmul.f32 %v1329_v21, %v3276_v41 }
 0x229   : > { %1382 = vst.msk [vmem:[#allocation3 + $0x71] sm:$0xff] %vm995_vm2, %v1352_v24  ;;  %v1350_v26 = vsel %vm1334_vm1, %v3270_v37, %v1342_v22  ;;  %v1343_v27 = vmul.f32 %v1325_v23, %v3281_v43  ;;  %v1386_v24 = vld [vmem:[#allocation3 + $0x20] ss:$2 sm:$0xf]  ;;  %vm1935_vm1 = vcmask 654336  }
 0x22a   : > { %1380 = vst.msk [vmem:[#allocation3 + $0x51] sm:$0xff] %vm995_vm2, %v1350_v26  ;;  %v1353_v28 = vsel %vm1337_vm3, %v3276_v41, %v1345_v25  ;;  %v1392_v26 = vpack.c.bf16 %v1386_v24, %v1386_v24  ;;  %vm1940_vm3 = vcmask 785408  }
 0x22b   : > { %1383 = vst.msk [vmem:[#allocation3 + $0x81] sm:$0xff] %vm995_vm2, %v1353_v28  ;;  %v1351_v29 = vsel %vm1335_vm4, %v3281_v43, %v1343_v27  ;;  %vm1945_vm4 = vcmask 916480  }
 0x22c   : > { %1381 = vst.msk [vmem:[#allocation3 + $0x61] sm:$0xff] %vm995_vm2, %v1351_v29 }
 0x230   : > { %v1425_v30 = vld [vmem:[#allocation3 + $0x70] ss:$2 sm:$0xf]  ;;  %v1437_v35 = vld [vmem:[#allocation3 + $0x71] ss:$2 sm:$0xf] }
 0x231   : > { %v1429_v31 = vpack.c.bf16 %v1425_v30, %v1425_v30  ;;  %v1423_v32 = vld [vmem:[#allocation3 + $0x50] ss:$2 sm:$0xf]  ;;  %v1435_v36 = vld [vmem:[#allocation3 + $0x51] ss:$2 sm:$0xf]  ;;  %v1441_v37 = vpack.c.bf16 %v1437_v35, %v1437_v35 }
 0x232   : > { %v1428_v34 = vpack.c.bf16 %v1423_v32, %v1423_v32  ;;  %v1440_v38 = vpack.c.bf16 %v1435_v36, %v1435_v36  ;;  %v1449_v39 = vld [vmem:[#allocation3 + $0x72] ss:$2 sm:$0xf]  ;;  %v1461_v43 = vld [vmem:[#allocation3 + $0x80] ss:$2 sm:$0xf] }
 0x233   : > { %1524 = vrot.lane.b32.xlu1 %v1429_v31, %s2762_s16  ;;  %v1447_v40 = vld [vmem:[#allocation3 + $0x52] ss:$2 sm:$0xf]  ;;  %v1453_v41 = vpack.c.bf16 %v1449_v39, %v1449_v39  ;;  %v1459_v45 = vld [vmem:[#allocation3 + $0x60] ss:$2 sm:$0xf]  ;;  %v1465_v18 = vpack.c.bf16 %v1461_v43, %v1461_v43 }
 0x234   : > { %1522 = vrot.lane.b32.xlu0 %v1428_v34, %s2762_s16  ;;  %v1452_v42 = vpack.c.bf16 %v1447_v40, %v1447_v40  ;;  %v1464_v46 = vpack.c.bf16 %v1459_v45, %v1459_v45  ;;  %v1473_v47 = vld [vmem:[#allocation3 + $0x81] ss:$2 sm:$0xf]  ;;  %v1483_v51 = vld [vmem:[#allocation3 + $0x62] ss:$2 sm:$0xf] }
 0x235   : > { %v1471_v48 = vld [vmem:[#allocation3 + $0x61] ss:$2 sm:$0xf]  ;;  %v1477_v33 = vpack.c.bf16 %v1473_v47, %v1473_v47  ;;  %v1488_v55 = vpack.c.bf16 %v1483_v51, %v1483_v51  ;;  %v1414_v56 = vld [vmem:[#allocation3 + $0x62] ss:$2 sm:$0xf] }
 0x236   : > { %v1476_v50 = vpack.c.bf16 %v1471_v48, %v1471_v48  ;;  %v1402_v20 = vld [vmem:[#allocation3 + $0x61] ss:$2 sm:$0xf]  ;;  %v1418_v57 = vpack.c.bf16 %v1414_v56, %v1414_v56  ;;  %v1485_v62 = vld [vmem:[#allocation3 + $0x82] ss:$2 sm:$0xf] }
 0x237   : > { %1536 = vrot.lane.b32.xlu1 %v1441_v37, %s3542_s28  ;;  %v1406_v52 = vpack.c.bf16 %v1402_v20, %v1402_v20  ;;  %v1489_v63 = vpack.c.bf16 %v1485_v62, %v1485_v62  ;;  %v1384_v30 = vld [vmem:[#allocation3] ss:$2 sm:$0xf]  ;;  %s2239_s16 = scalar_lea.sflag [#allocation6], %s404_s29 }
 0x238   : > { %1534 = vrot.lane.b32.xlu0 %v1440_v38, %s3542_s28  ;;  %s3553_s28 = smov 64   ;;  %v1391_v32 = vpack.c.bf16 %v1384_v30, %v1384_v30  ;;  %v1390_v38 = vld [vmem:[#allocation3 + $0x60] ss:$2 sm:$0xf] }
 0x23a   : > { %v1588_v39 = vsel %vm995_vm2, %v1391_v32, %v1495_v1 }
 0x23b   : > { %1548 = vrot.lane.b32.xlu1 %v1453_v41, %s2765_s15  ;;  %v1388_v41 = vld [vmem:[#allocation3 + $0x40] ss:$2 sm:$0xf]  ;;  %v1599_v45 = vsel %vm1029_vm5, %v1588_v39, %v1507_v2 }
 0x23c   : > { %1546 = vrot.lane.b32.xlu0 %v1452_v42, %s2765_s15  ;;  %v1394_v42 = vpack.c.bf16 %v1390_v38, %v1390_v38  ;;  %v1393_v47 = vpack.c.bf16 %v1388_v41, %v1388_v41 }
 0x23f   : > { %1560 = vrot.lane.b32.xlu1 %v1465_v18, %s2766_s19  ;;  %v2770_v18 = vmov 1983009808  }
 0x240   : > { %1558 = vrot.lane.b32.xlu0 %v1464_v46, %s2766_s19  ;;  %v1674_v46 = vunpack.c.l.s4 %v2770_v18 }
 0x242   : > { %v1675_v54 = vunpack.c.0.s8 %v1674_v46 }
 0x243   : > { %1572 = vrot.lane.b32.xlu1 %v1477_v33, %s2767_s17 }
 0x244   : > { %1570 = vrot.lane.b32.xlu0 %v1476_v50, %s2767_s17  ;;  %s2424_s17 = sshll.u32 %s2864_s25, 4  ;;  %s2777_s25 = smov [#allocation5]  }
 0x245   : > { %s2696_s0 = sshll.u32 %s2777_s25, 4  ;;  %s2697_s0 = int_to_ptr.vmem [resolvable:$false] %s2696_s0 }
 0x246   : > { %s2698_s1 = scalar_lea.vmem %s2697_s0, 32 }
 0x247   : > { %1500 = vrot.lane.b32.xlu1 %v1406_v52, %s2758_s26  ;;  %s3554_s26 = smov 32  }
 0x248   : > { %1582 = vrot.lane.b32.xlu0 %v1488_v55, %s3553_s28  ;;  %v3357_v55 = vshrl.u32 %v1676_v44, 7 }
 0x24b   : > { %1512 = vrot.lane.b32.xlu1 %v1418_v57, %s3551_s20 }
 0x24f   : > { %1580 = vrot.lane.b32.xlu1 %v1487_v61, %s3553_s28 }
 0x253   : > { %1584 = vrot.lane.b32.xlu1 %v1489_v63, %s3553_s28 }
 0x269   : > { %v1521_v4 = vpop.permute.xlu1 %1520 }
 0x26a   : > { %v1519_v3 = vpop.permute.xlu0 %1518 }
 0x26b   : > { %v1607_v51 = vsel %vm1063_vm7, %v1599_v45, %v1519_v3 }
 0x26d   : > { %v1533_v6 = vpop.permute.xlu1 %1532 }
 0x26e   : > { %v1531_v5 = vpop.permute.xlu0 %1530 }
 0x26f   : > { %v1615_v56 = vsel %vm1097_vm9, %v1607_v51, %v1531_v5 }
 0x271   : > { %v1545_v8 = vpop.permute.xlu1 %1544 }
 0x272   : > { %v1543_v7 = vpop.permute.xlu0 %1542 }
 0x273   : > { %v1624_v58 = vsel %vm1622_vm10, %v1615_v56, %v1543_v7 }
 0x275   : > { %v1557_v10 = vpop.permute.xlu1 %1556 }
 0x276   : > { %v1499_v9 = vpop.permute.xlu0 %1498 }
 0x277   : > { %v1594_v52 = vsel %vm995_vm2, %v1393_v47, %v1499_v9 }
 0x279   : > { %v1569_v12 = vpop.permute.xlu1 %1568 }
 0x27a   : > { %v1511_v11 = vpop.permute.xlu0 %1510 }
 0x27b   : > { %v1603_v57 = vsel %vm1029_vm5, %v1594_v52, %v1511_v11  ;;  %v1678_v11 = vsub.s32 %v1675_v54, %v3357_v55  ;;  %v2771_v54 = vmov 0  }
 0x27c   : > { %2083 = vmatprep.subr.bf16.mxu0 %v2771_v54 }
 0x27d   : > { %v1497_v14 = vpop.permute.xlu1 %1496 }
 0x27e   : > { %v1555_v13 = vpop.permute.xlu0 %1554  ;;  %v1591_v27 = vsel %vm995_vm2, %v1392_v26, %v1497_v14 }
 0x27f   : > { %v1633_v1 = vsel %vm1631_vm11, %v1624_v58, %v1555_v13 }
 0x281   : > { %v1509_v16 = vpop.permute.xlu1 %1508 }
 0x282   : > { %v1567_v15 = vpop.permute.xlu0 %1566  ;;  %v1601_v31 = vsel %vm1029_vm5, %v1591_v27, %v1509_v16  ;;  %v2409_v27 = vld [vmem:[%s3526_s5] ss:$0 sm:$0xff] }
 0x283   : > { %v1609_v34 = vsel %vm1063_vm7, %v1601_v31, %v1521_v4  ;;  %v1642_v5 = vsel %vm1640_vm12, %v1633_v1, %v1567_v15 }
 0x284   : > { %v1617_v37 = vsel %vm1097_vm9, %v1609_v34, %v1533_v6 }
 0x285   : > { %v1626_v43 = vsel %vm1622_vm10, %v1617_v37, %v1545_v8 }
 0x286   : > { %v1579_v17 = vpop.permute.xlu0 %1578  ;;  %v1635_v20 = vsel %vm1631_vm11, %v1626_v43, %v1557_v10 }
 0x287   : > { %v1644_v59 = vsel %vm1640_vm12, %v1635_v20, %v1569_v12  ;;  %v1651_v8 = vsel %vm1649_vm13, %v1642_v5, %v1579_v17 }
 0x2a5   : > { %v1525_v19 = vpop.permute.xlu1 %1524 }
 0x2a6   : > { %v1523_v21 = vpop.permute.xlu0 %1522 }
 0x2a7   : > { %v1611_v61 = vsel %vm1063_vm7, %v1603_v57, %v1523_v21 }
 0x2a9   : > { %v1537_v22 = vpop.permute.xlu1 %1536 }
 0x2aa   : > { %v1535_v23 = vpop.permute.xlu0 %1534 }
 0x2ab   : > { %v1619_v2 = vsel %vm1097_vm9, %v1611_v61, %v1535_v23 }
 0x2ad   : > { %v1549_v25 = vpop.permute.xlu1 %1548 }
 0x2ae   : > { %v1547_v28 = vpop.permute.xlu0 %1546 }
 0x2af   : > { %v1628_v6 = vsel %vm1622_vm10, %v1619_v2, %v1547_v28 }
 0x2b1   : > { %v1561_v29 = vpop.permute.xlu1 %1560 }
 0x2b2   : > { %v1559_v36 = vpop.permute.xlu0 %1558 }
 0x2b3   : > { %v1637_v9 = vsel %vm1631_vm11, %v1628_v6, %v1559_v36  ;;  %v2641_v6 = vld [vmem:[%s3528_s7 + $0x10] sm:$0xff]  }
 0x2b5   : > { %v1573_v35 = vpop.permute.xlu1 %1572 }
 0x2b6   : > { %v1571_v48 = vpop.permute.xlu0 %1570 }
 0x2b7   : > { %v1646_v10 = vsel %vm1640_vm12, %v1637_v9, %v1571_v48 }
 0x2b9   : > { %v1501_v40 = vpop.permute.xlu1 %1500 }
 0x2ba   : > { %v1597_v49 = vsel %vm995_vm2, %v1394_v42, %v1501_v40  ;;  %v1583_v7 = vpop.permute.xlu0 %1582  ;;  %vm1715_vm2 = vcmask 588800  }
 0x2bb   : > { %v1655_v16 = vsel %vm1649_vm13, %v1646_v10, %v1583_v7 }
 0x2bd   : > { %v1513_v33 = vpop.permute.xlu1 %1512 }
 0x2be   : > { %v1605_v50 = vsel %vm1029_vm5, %v1597_v49, %v1513_v33 }
 0x2bf   : > { %v1613_v53 = vsel %vm1063_vm7, %v1605_v50, %v1525_v19  ;;  %vm1804_vm7 = vcmask 128000  }
 0x2c0   : > { %v1621_v60 = vsel %vm1097_vm9, %v1613_v53, %v1537_v22  ;;  %1805 = vst.msk [vmem:[#allocation4] sm:$0x3f] %vm1804_vm7, %v2756_v0  ;;  %1806 = vst.msk [vmem:[#allocation4 + $0x8] sm:$0x3f] %vm1804_vm7, %v2756_v0 }
 0x2c1   : > { %v1581_v62 = vpop.permute.xlu1 %1580  ;;  %v1630_v63 = vsel %vm1622_vm10, %v1621_v60, %v1549_v25  ;;  %1807 = vst.msk [vmem:[#allocation4 + $0x10] sm:$0x3f] %vm1804_vm7, %v2756_v0  ;;  %1808 = vst.msk [vmem:[#allocation4 + $0x18] sm:$0x3f] %vm1804_vm7, %v2756_v0  ;;  %v2639_v60 = vld [vmem:[%s3528_s7] sm:$0xff]  }
 0x2c2   : > { %v1653_v3 = vsel %vm1649_vm13, %v1644_v59, %v1581_v62  ;;  %v1639_v4 = vsel %vm1631_vm11, %v1630_v63, %v1561_v29  ;;  %1809 = vst.msk [vmem:[#allocation4 + $0x20] sm:$0x3f] %vm1804_vm7, %v2756_v0  ;;  %v2410_v29 = vld [vmem:[%s3527_s6] ss:$0 sm:$0xff]  ;;  %2084 = vmatpush1.bf16.msra.mxu0 %v2639_v60  ;;  %v2640_v59 = vld [vmem:[%s3528_s7 + $0x8] sm:$0xff]  }
 0x2c3   : > { %v1671_v12 = vcombine.low %v1651_v8, %v1653_v3  ;;  %v1648_v14 = vsel %vm1640_vm12, %v1639_v4, %v1573_v35  ;;  %2085 = vmatprep.subr.bf16.mxu0 %v2771_v54 }
 0x2c5   : > { %v1585_v13 = vpop.permute.xlu1 %1584  ;;  %v1679_v21 = vrot.slane %v1671_v12, %v1678_v11 }
 0x2c6   : > { %v1657_v19 = vsel %vm1649_vm13, %v1648_v14, %v1585_v13  ;;  %2086 = vmatpush1.bf16.msra.mxu0 %v2640_v59  ;;  %v2643_v14 = vld [vmem:[%s3528_s7 + $0x20] sm:$0xff]  }
 0x2c7   : > { %v1672_v15 = vcombine.low %v1655_v16, %v1657_v19  ;;  %v1829_v17 = vld [vmem:[#allocation4 + $0x1] ss:$2 sm:$0x3]  ;;  %v1835_v24 = vld [vmem:[#allocation4 + $0x2] ss:$2 sm:$0x3]  ;;  %2087 = vmatprep.subr.bf16.mxu0 %v2771_v54 }
 0x2c8   : > { %v1832_v25 = vpack.c.bf16 %v1829_v17, %v1829_v17  ;;  %v1838_v26 = vpack.c.bf16 %v1835_v24, %v1835_v24  ;;  %v2644_v17 = vld [vmem:[%s3528_s7 + $0x28] sm:$0xff]  }
 0x2c9   : > { %v1686_v22 = vrot.slane %v1672_v15, %v1678_v11  ;;  %v2642_v11 = vld [vmem:[%s3528_s7 + $0x18] sm:$0xff]  }
 0x2ca   : > { %1877 = vrot.lane.b32.xlu0 %v1832_v25, %s3551_s20  ;;  %2088 = vmatpush1.bf16.msra.mxu0 %v2641_v6  ;;  %v2645_v25 = vld [vmem:[%s3528_s7 + $0x30] sm:$0xff]  }
 0x2cb   : > { %v1687_v23 = vcombine.low %v1679_v21, %v1686_v22  ;;  %2089 = vmatprep.subr.bf16.mxu0 %v2771_v54 }
 0x2cd   : > { %2550 = vmatmul.mubr.msk.bf16.vlgmr.msra.gmra.mrb[8].mxu1 %vm1715_vm2, %v1687_v23 }
 0x2ce   : > { %2561 = vmatprep.mubr.msk.f32.mxu1 %vm2769_vm8, %v2756_v0  ;;  %1883 = vrot.lane.b32.xlu0 %v1838_v26, %s3554_s26  ;;  %vm2236_vm8 = vcmask 253952  }
 0x2cf   : > { %2090 = vmatpush1.bf16.msra.mxu0 %v2642_v11 }
 0x2d0   : > { %2091 = vmatprep.subr.bf16.mxu0 %v2771_v54 }
 0x2d3   : > { %2092 = vmatpush1.bf16.msra.mxu0 %v2643_v14 }
 0x2d4   : > { %2093 = vmatprep.subr.bf16.mxu0 %v2771_v54 }
 0x2d7   : > { %2094 = vmatpush1.bf16.msra.mxu0 %v2644_v17 }
 0x2d8   : > { %2095 = vmatprep.subr.bf16.mxu0 %v2771_v54 }
 0x2db   : > { %2096 = vmatpush1.bf16.msra.mxu0 %v2645_v25 }
 0x2dc   : > { %2097 = vmatprep.subr.bf16.mxu0 %v2771_v54 }
 0x3a0   : > { %v1757_v28 = vpop.f32.mrb[8].mxu1 }
 0x3a1   : > { %v1771_v30 = vmul.f32 %v2409_v27, %v1757_v28  ;;  %v2551_v31 = vpop.f32.mrb[9].mxu1  ;;  %v2646_v28 = vld [vmem:[%s3528_s7 + $0x38] sm:$0xff]  }
 0x3a2   : > { %v1760_v0 = vpop.f32.mrb[10].mxu1  ;;  %2098 = vmatpush1.bf16.msra.mxu0 %v2646_v28 }
 0x3a3   : > { %v1780_v32 = vadd.f32 %v2410_v29, %v1771_v30  ;;  %v1772_v34 = vmul.f32 %v2409_v27, %v1760_v0  ;;  %v2552_v35 = vpop.f32.mrb[11].mxu1  ;;  %2099 = vmatprep.subr.bf16.mxu0 %v2771_v54  ;;  %v1878_v30 = vpop.permute.xlu0 %1877 }
 0x3a5   : > { %v1782_v36 = vmin.f32 %v1780_v32, 20.0  ;;  %v1781_v37 = vadd.f32 %v2410_v29, %v1772_v34  ;;  %vm1798_vm15 = vcmp.gt.f32.partialorder %v1780_v32, 20.0  ;;  %v2647_v29 = vld [vmem:[%s3528_s7 + $0x40] sm:$0xff]   ;;  %v1823_v34 = vld [vmem:[#allocation4] ss:$2 sm:$0x3] }
 0x3a6   : > { %2100 = vmatpush1.bf16.msra.mxu0 %v2647_v29 }
 0x3a7   : > { %v1784_v38 = vmul.f32 1.442695, %v1782_v36  ;;  %v1783_v39 = vmin.f32 %v1781_v37, 20.0  ;;  %vm1799_vm0 = vcmp.gt.f32.partialorder %v1781_v37, 20.0  ;;  %v1884_v31 = vpop.permute.xlu0 %1883 }
 0x3a9   : > { %2680 = vpow2.f32 %v1784_v38  ;;  %v1786_v40 = vmul.f32 1.442695, %v1783_v39 }
 0x3ab   : > { %2682 = vpow2.f32 %v1786_v40 }
 0x3b3   : > { %v2681_v41 = vpop.eup %2680 }
 0x3b4   : > { %v1788_v42 = vadd.f32 2.0, %v2681_v41 }
 0x3b5   : > { %v2683_v43 = vpop.eup %2682 }
 0x3b6   : > { %v1790_v44 = vmul.f32 %v2681_v41, %v1788_v42  ;;  %v1789_v45 = vadd.f32 2.0, %v2683_v43 }
 0x3b8   : > { %v1792_v18 = vadd.f32 2.0, %v1790_v44  ;;  %v1791_v46 = vmul.f32 %v2683_v43, %v1789_v45 }
 0x3ba   : > { %2684 = vrcp.f32 %v1792_v18  ;;  %v1793_v47 = vadd.f32 2.0, %v1791_v46 }
 0x3bc   : > { %2686 = vrcp.f32 %v1793_v47 }
 0x3c4   : > { %v2685_v48 = vpop.eup %2684 }
 0x3c5   : > { %v1795_v49 = vmul.f32 %v2685_v48, %v1790_v44  ;;  %v2775_v44 = vmov 1966171168  }
 0x3c6   : > { %v2687_v33 = vpop.eup %2686  ;;  %v1956_v45 = vunpack.c.l.s4 %v2775_v44 }
 0x3c7   : > { %v1800_v50 = vmul.f32 %v1795_v49, %v1780_v32  ;;  %v1797_v20 = vmul.f32 %v2687_v33, %v1791_v46 }
 0x3c9   : > { %v1802_v51 = vsel %vm1798_vm15, %v1780_v32, %v1800_v50  ;;  %v1801_v52 = vmul.f32 %v1797_v20, %v1781_v37 }
 0x3ca   : > { %v1813_v53 = vcombine.high %v1802_v51, %v1802_v51  ;;  %1819 = vst.msk [vmem:[#allocation4 + $0x9] sm:$0xf] %vm1818_vm14, %v1802_v51  ;;  %v1957_v51 = vunpack.c.0.s8 %v1956_v45 }
 0x3cb   : > { %v1803_v56 = vsel %vm1799_vm0, %v1781_v37, %v1801_v52  ;;  %v1826_v37 = vpack.c.bf16 %v1823_v34, %v1823_v34 }
 0x3cc   : > { %1820 = vst.msk [vmem:[#allocation4 + $0x11] sm:$0xf] %vm1818_vm14, %v1813_v53  ;;  %v1814_v57 = vcombine.high %v1803_v56, %v1803_v56  ;;  %1821 = vst.msk [vmem:[#allocation4 + $0x19] sm:$0xf] %vm1818_vm14, %v1803_v56  ;;  %v1960_v59 = vsub.s32 %v1957_v51, %v3357_v55 }
 0x3cd   : > { %v1919_v40 = vsel %vm1029_vm5, %v1826_v37, %v1878_v30 }
 0x3ce   : > { %1822 = vst.msk [vmem:[#allocation4 + $0x21] sm:$0xf] %vm1818_vm14, %v1814_v57  ;;  %v1924_v42 = vsel %vm1097_vm9, %v1919_v40, %v1884_v31 }
 0x3d1   : > { %v1840_v58 = vld [vmem:[#allocation4 + $0x8] ss:$2 sm:$0x3]  ;;  %v1846_v63 = vld [vmem:[#allocation4 + $0x9] ss:$2 sm:$0x3] }
 0x3d2   : > { %v1843_v61 = vpack.c.bf16 %v1840_v58, %v1840_v58  ;;  %v1849_v3 = vpack.c.bf16 %v1846_v63, %v1846_v63  ;;  %v1852_v4 = vld [vmem:[#allocation4 + $0xa] ss:$2 sm:$0x3] }
 0x3d3   : > { %v1831_v62 = vld [vmem:[#allocation4 + $0x11] ss:$2 sm:$0x3]  ;;  %v1837_v2 = vld [vmem:[#allocation4 + $0x12] ss:$2 sm:$0x3]  ;;  %v1855_v8 = vpack.c.bf16 %v1852_v4, %v1852_v4 }
 0x3d4   : > { %1889 = vrot.lane.b32.xlu0 %v1843_v61, %s2766_s19  ;;  %v1833_v1 = vpack.c.bf16 %v1831_v62, %v1831_v62  ;;  %v1839_v5 = vpack.c.bf16 %v1837_v2, %v1837_v2  ;;  %v1842_v7 = vld [vmem:[#allocation4 + $0x18] ss:$2 sm:$0x3]  ;;  %v1858_v9 = vld [vmem:[#allocation4 + $0x10] ss:$2 sm:$0x3] }
 0x3d5   : > { %v1844_v10 = vpack.c.bf16 %v1842_v7, %v1842_v7  ;;  %v1848_v12 = vld [vmem:[#allocation4 + $0x19] ss:$2 sm:$0x3]  ;;  %v1861_v13 = vpack.c.bf16 %v1858_v9, %v1858_v9  ;;  %v1864_v16 = vld [vmem:[#allocation4 + $0x11] ss:$2 sm:$0x3] }
 0x3d6   : > { %1879 = vrot.lane.b32.xlu1 %v1833_v1, %s3551_s20  ;;  %v1850_v19 = vpack.c.bf16 %v1848_v12, %v1848_v12  ;;  %v1854_v15 = vld [vmem:[#allocation4 + $0x1a] ss:$2 sm:$0x3]  ;;  %v1867_v21 = vpack.c.bf16 %v1864_v16, %v1864_v16  ;;  %v1860_v23 = vld [vmem:[#allocation4 + $0x20] ss:$2 sm:$0x3]  ;;  %s3479_s20 = scalar_lea.hbm %s3533_s12, %s2424_s17 }
 0x3d7   : > { %v1856_v22 = vpack.c.bf16 %v1854_v15, %v1854_v15  ;;  %v1862_v24 = vpack.c.bf16 %v1860_v23, %v1860_v23  ;;  %v1866_v26 = vld [vmem:[#allocation4 + $0x21] ss:$2 sm:$0x3]  ;;  %v1825_v18 = vld [vmem:[#allocation4 + $0x10] ss:$2 sm:$0x3] }
 0x3d8   : > { %1895 = vrot.lane.b32.xlu0 %v1849_v3, %s3553_s28  ;;  %v1868_v27 = vpack.c.bf16 %v1866_v26, %v1866_v26  ;;  %v1827_v33 = vpack.c.bf16 %v1825_v18, %v1825_v18  ;;  %v1870_v20 = vld [vmem:[#allocation4 + $0x12] ss:$2 sm:$0x3]  ;;  %v1872_v61 = vld [vmem:[#allocation4 + $0x22] ss:$2 sm:$0x3] }
 0x3d9   : > { %v1873_v60 = vpack.c.bf16 %v1870_v20, %v1870_v20  ;;  %v1874_v3 = vpack.c.bf16 %v1872_v61, %v1872_v61  ;;  %v2158_v16 = vld [vmem:[%s3531_s10] sm:$0xff]  ;;  %v2160_v15 = vld [vmem:[%s3531_s10 + $0x10] sm:$0xff]  ;;  %v2161_v23 = vld [vmem:[%s3531_s10 + $0x18] sm:$0xff] }
 0x3da   : > { %1885 = vrot.lane.b32.xlu1 %v1839_v5, %s3554_s26  ;;  %s2773_s26 = smov 96   ;;  %v2568_v17 = vpack.c.bf16 %v2161_v23, %v2160_v15  ;;  %v2422_v26 = vld [vmem:[%s3530_s9] ss:$0 sm:$0xff] }
 0x3dc   : > { %1901 = vrot.lane.b32.xlu0 %v1855_v8, %s2772_s18 }
 0x3de   : > { %1891 = vrot.lane.b32.xlu1 %v1844_v10, %s2766_s19  ;;  %s2774_s19 = smov 112  }
 0x3e0   : > { %1907 = vrot.lane.b32.xlu0 %v1861_v13, %s2773_s26 }
 0x3e2   : > { %1897 = vrot.lane.b32.xlu1 %v1850_v19, %s3553_s28  ;;  %v2159_v19 = vld [vmem:[%s3531_s10 + $0x8] sm:$0xff] }
 0x3e4   : > { %1913 = vrot.lane.b32.xlu0 %v1867_v21, %s2774_s19  ;;  %v2776_v21 = vmov 0.0|0.0  }
 0x3e5   : > { %2564 = vmatprep.subr.bf16.mxu1 %v2776_v21 }
 0x3e6   : > { %1903 = vrot.lane.b32.xlu1 %v1856_v22, %s2772_s18  ;;  %v2565_v22 = vpack.c.bf16 %v2159_v19, %v2158_v16  ;;  %s405_s18 = scalar_lea.vmem [#allocation5], %s404_s29 }
 0x3e7   : > { %s2251_s15 = sshll.u32 %s405_s18, 4  ;;  %s3481_s15 = int_to_ptr.vmem [resolvable:$true] %s2251_s15 }
 0x3e8   : > { %2566 = vmatpush3.bf16.msra.mxu1 %v2565_v22  ;;  %s2692_s28 = scalar_lea.vmem %s3481_s15, 16  ;;  %p2699_p0 = scmp.lt.s32.totalorder %s3481_s15, %s2697_s0 }
 0x3e9   : > { %2567 = vmatprep.subr.bf16.mxu1 %v2776_v21  ;;  %p2693_p11 = scmp.ne.s32.totalorder %s3481_s15, %s2692_s28  ;;  %p2700_p1 = scmp.lt.s32.totalorder %s2698_s1, %s2692_s28 }
 0x3ea   : > { %1909 = vrot.lane.b32.xlu1 %v1862_v24, %s2773_s26  ;;  %v2421_v24 = vld [vmem:[%s3529_s8] ss:$0 sm:$0xff] }
 0x3eb   : > { %p2694_p12 = pnand %p2693_p11, %p2881_p5  ;;  %p2701_p2 = por %p2700_p1, %p2699_p0 }
 0x3ec   : > { %2569 = vmatpush3.bf16.msra.mxu1 %v2568_v17 }
 0x3ed   : > { %p2695_p13 = pneg %p2694_p12 }
 0x3ee   : > { %1915 = vrot.lane.b32.xlu1 %v1868_v27, %s2774_s19 }
 0x3ef   : > { %p2702_p3 = pnand %p2701_p2, %p2695_p13 }
 0x446   : > { %v1890_v0 = vpop.permute.xlu0 %1889 }
 0x447   : > { %v1928_v46 = vsel %vm1631_vm11, %v1924_v42, %v1890_v0 }
 0x448   : > { %v1880_v32 = vpop.permute.xlu1 %1879 }
 0x449   : > { %v1922_v53 = vsel %vm1029_vm5, %v1827_v33, %v1880_v32 }
 0x44a   : > { %v1896_v35 = vpop.permute.xlu0 %1895 }
 0x44b   : > { %v1932_v47 = vsel %vm1649_vm13, %v1928_v46, %v1896_v35 }
 0x44c   : > { %v1886_v36 = vpop.permute.xlu1 %1885 }
 0x44d   : > { %v1926_v57 = vsel %vm1097_vm9, %v1922_v53, %v1886_v36 }
 0x44e   : > { %v1902_v38 = vpop.permute.xlu0 %1901 }
 0x44f   : > { %v1937_v50 = vsel %vm1935_vm1, %v1932_v47, %v1902_v38 }
 0x450   : > { %v1892_v39 = vpop.permute.xlu1 %1891 }
 0x451   : > { %v1930_v58 = vsel %vm1631_vm11, %v1926_v57, %v1892_v39 }
 0x452   : > { %v1908_v41 = vpop.permute.xlu0 %1907 }
 0x453   : > { %v1942_v52 = vsel %vm1940_vm3, %v1937_v50, %v1908_v41 }
 0x454   : > { %v1898_v43 = vpop.permute.xlu1 %1897 }
 0x455   : > { %v1934_v62 = vsel %vm1649_vm13, %v1930_v58, %v1898_v43 }
 0x456   : > { %v1914_v48 = vpop.permute.xlu0 %1913 }
 0x457   : > { %v1947_v56 = vsel %vm1945_vm4, %v1942_v52, %v1914_v48  ;;  %v2162_v48 = vld [vmem:[%s3532_s11] sm:$0x1] }
 0x458   : > { %v1904_v49 = vpop.permute.xlu1 %1903  ;;  %v1954_v63 = vcombine.low %v1947_v56, %v1873_v60 }
 0x459   : > { %v1939_v1 = vsel %vm1935_vm1, %v1934_v62, %v1904_v49 }
 0x45a   : > { %v1961_v6 = vrot.slane %v1954_v63, %v1960_v59 }
 0x45c   : > { %v1910_v54 = vpop.permute.xlu1 %1909  ;;  %v1968_v9 = vrot.slane %v1961_v6, %v1960_v59 }
 0x45d   : > { %v1944_v2 = vsel %vm1940_vm3, %v1939_v1, %v1910_v54 }
 0x460   : > { %v1916_v4 = vpop.permute.xlu1 %1915 }
 0x461   : > { %v1949_v5 = vsel %vm1945_vm4, %v1944_v2, %v1916_v4 }
 0x462   : > { %v1969_v7 = vcombine.low %v1949_v5, %v1874_v3 }
 0x464   : > { %v1976_v8 = vrot.slane %v1969_v7, %v1960_v59 }
 0x466   : > { %v1983_v10 = vrot.slane %v1976_v8, %v1960_v59 }
 0x468   : > { %v2002_v11 = vcombine.low %v1968_v9, %v1983_v10 }
 0x46a   : > { %v2009_v12 = vrot.slane %v2002_v11, %v1960_v59 }
 0x46c   : > { %v2010_v13 = vcombine.high %v2009_v12, %v2009_v12  ;;  %v2017_v14 = vrot.slane %v2009_v12, %v1960_v59 }
 0x46e   : > { %v2024_v55 = vrot.slane %v2010_v13, %v1960_v59 }
 0x470   : > { %2420 = vmatprep.mubr.msk.bf16.mxu0 %vm1029_vm5, %v2024_v55  ;;  %vm2150_vm5 = vcmask 257024  }
 0x471   : > { %2116 = vmatmul.mubr.bf16.vlgmr.msra.gmra.mrb[0].mxu0 %v2017_v14 }
 0x544   : > { %v2117_v25 = vpop.f32.mrb[0].mxu0 }
 0x545   : > { %v2130_v27 = vmul.f32 %v2421_v24, %v2117_v25  ;;  %v2119_v28 = vpop.f32.mrb[1].mxu0 }
 0x546   : > { %v2120_v29 = vpop.f32.mrb[2].mxu0 }
 0x547   : > { %v2138_v30 = vadd.f32 %v2422_v26, %v2130_v27  ;;  %v2121_v31 = vpop.f32.mrb[3].mxu0 }
 0x549   : > { %v2139_v0 = vmin.f32 %v2138_v30, 20.0  ;;  %vm2147_vm6 = vcmp.gt.f32.partialorder %v2138_v30, 20.0 }
 0x54b   : > { %v2140_v32 = vmul.f32 1.442695, %v2139_v0 }
 0x54d   : > { %2688 = vpow2.f32 %v2140_v32 }
 0x557   : > { %v2689_v34 = vpop.eup %2688 }
 0x558   : > { %v2142_v35 = vadd.f32 2.0, %v2689_v34 }
 0x55a   : > { %v2143_v36 = vmul.f32 %v2689_v34, %v2142_v35 }
 0x55c   : > { %v2144_v37 = vadd.f32 2.0, %v2143_v36 }
 0x55e   : > { %2690 = vrcp.f32 %v2144_v37 }
 0x568   : > { %v2691_v38 = vpop.eup %2690 }
 0x569   : > { %v2146_v39 = vmul.f32 %v2691_v38, %v2143_v36 }
 0x56b   : > { %v2148_v40 = vmul.f32 %v2146_v39, %v2138_v30 }
 0x56d   : > { %v2149_v41 = vsel %vm2147_vm6, %v2138_v30, %v2148_v40 }
 0x56e   : > { %v2151_v42 = vsel %vm2150_vm5, %v2149_v41, 0.0 }
 0x56f   : > { %v2152_v43 = vrot.slane %v2151_v42, 4 }
 0x571   : > { %v2153_v44 = vadd.f32 %v2152_v43, %v2151_v42 }
 0x573   : > { %v2154_v45 = vrot.slane %v2153_v44, 2 }
 0x575   : > { %v2155_v18 = vadd.f32 %v2154_v45, %v2153_v44 }
 0x577   : > { %v2156_v46 = vrot.slane %v2155_v18, 1 }
 0x579   : > { %v2157_v47 = vadd.f32 %v2156_v46, %v2155_v18 }
 0x57b   : > { %2562 = vmatmul.mubr.msk.f32.vlgmr.msra.gmra.mrb[12].mxu1 %vm1097_vm9, %v2157_v47 }
 0x64e   : > { %v2232_v49 = vpop.f32.mrb[12].mxu1 }
 0x64f   : > { %v2233_v33 = vadd.f32 %v2232_v49, %v2162_v48  ;;  %v2563_v50 = vpop.f32.mrb[13].mxu1 }
 0x651   : > { %2237 = vst.msk [vmem:[%s405_s18] sm:$0x1] %vm2236_vm8, %v2233_v33 }
 0x652   : > { %2705 = shalt.err (!%p2702_p3)
}
 0x653   : > { %s2706_s29 = scalar_lea.hbm %s3479_s20, 16  ;;  %s2710_s26 = scalar_lea.hbm %s3533_s12, 32 }
 0x654   : > { %p2707_p4 = scmp.ne.s32.totalorder %s3479_s20, %s2706_s29  ;;  %p2711_p9 = scmp.lt.u32.totalorder %s3479_s20, %s3533_s12 }
 0x655   : > { %p2712_p10 = scmp.lt.u32.totalorder %s2710_s26, %s2706_s29  ;;  %p2714_p12 = scmp.lt.u32.totalorder %s2706_s29, %s3479_s20 }
 0x656   : > { %p2708_p7 = pnand %p2707_p4, %p2881_p5 }
 0x657   : > { %p2713_p11 = por %p2712_p10, %p2711_p9 }
 0x658   : > { %p2709_p8 = pneg %p2708_p7 }
 0x659   : > { %p2715_p13 = por %p2714_p12, %p2713_p11 }
 0x65b   : > { %p2716_p0 = pnand %p2715_p13, %p2709_p8 }
 0x65d   : > { %2719 = shalt.err (!%p2716_p0)
}
 0x65e   : > { %2571 = dma.vmem_to_hbm [thread:$0]  (%p2881_p5), %s3481_s15, 16, %s3479_s20, %s2239_s16  }
 0x65f PF: > { %p2577_p1 = scmp.ge.s32.totalorder %s2754_s24, 2  ;;  %s2263_s1 = sand.u32 1, %s2742_s21  }
 0x660   : > { %s2264_s28 = scalar_lea.sflag [#allocation6], %s2263_s1 }
 0x661   : > { %p2574_p2 = pnand %p2577_p1, %p2885_p6 }
 0x663   : > { %2737 = dma.done.wait (!%p2574_p2), %s2264_s28, 16  }
 0x664   : > { %2739 = vsyncadd (!%p2574_p2), %s2264_s28, 4294967280  ;;  %p22_p3 = scmp.ge.s32.totalorder %s2868_s27, 4   ;;  %s3555_s21 = smov %s2746_s22 }
 0x665   : > { %s3556_s22 = smov %s2750_s23  ;;  %s3557_s23 = smov %s2879_s30 }
 0x666   : > { %s3558_s24 = smov %s2868_s27  ;;  %24 = sbr.rel (!%p22_p3) target bundleno = 6 (0x6), region = 226 }
 0x66d   :  { %2268 = vsyncpa [#allocation6], 1 }
 0x66e   :  { %2270 = vsyncpa [#allocation6 + $0x1], 1 }

</bundles_post_ra>
